<compile_context>
chip_gen: v7x
topology: tpu7x:2x2x1
jax: 0.10.0
libtpu: 0.0.40
codegen_flags: <defaults>
</compile_context>

<pallas_src>
import math
import functools

import jax
import jax.numpy as jnp
from jax.experimental import pallas as pl
from jax.experimental.pallas import tpu as pltpu


def _attention_pool_kernel(x_ref, pos0_ref, posr_ref, wq_ref, bq_ref,
                           wkv_ref, bkv_ref, wc_ref, bc_ref, hs_ref, hst_ref,
                           out_ref, *, num_heads):
    # x_ref:    (Bblk, HW, C)   spatial tokens for this batch block
    # pos0_ref: (1, C)          positional embedding of the mean token
    # posr_ref: (HW, C)         positional embeddings of the spatial tokens
    # wq_ref:   (C, C)          q projection (token-0 query only needs this)
    # wkv_ref:  (C, 2C)         k|v projection
    # wc_ref:   (C, Dout)       output projection
    # hs_ref:   (C, H)          0/1 head-membership matrix
    # hst_ref:  (H, C)          its transpose (per-head -> per-channel broadcast)
    # out_ref:  (Bblk, Dout)
    bblk, hw, c = x_ref.shape
    ch = c // num_heads
    x = x_ref[...]                                                # [Bblk, HW, C]

    # Token 0 = mean over spatial tokens; add positional embeddings.
    tok0 = jnp.mean(x, axis=1) + pos0_ref[...]                    # [Bblk, C]
    tokr = (x + posr_ref[...][None, :, :]).reshape(bblk * hw, c)  # [Bblk*HW, C]

    # Only token 0 is emitted -> only its query is needed.
    scale2 = 1.0 / math.sqrt(ch)      # (1/ch**0.25) applied to both q and k
    q0 = (jnp.dot(tok0, wq_ref[...], preferred_element_type=jnp.float32)
          + bq_ref[...]) * scale2                                 # [Bblk, C]

    # k/v projections; batch folded into the matmul M dimension.
    kv0 = jnp.dot(tok0, wkv_ref[...],
                  preferred_element_type=jnp.float32) + bkv_ref[...]   # [Bblk, 2C]
    kvr = jnp.dot(tokr, wkv_ref[...],
                  preferred_element_type=jnp.float32) + bkv_ref[...]   # [Bblk*HW, 2C]
    k0, v0 = kv0[:, :c], kv0[:, c:]                               # [Bblk, C]
    kr = kvr[:, :c].reshape(bblk, hw, c)                          # [Bblk, HW, C]
    vr = kvr[:, c:].reshape(bblk, hw, c)                          # [Bblk, HW, C]

    # Per-head scores via the head-membership matmul (no per-head lane slices).
    hs = hs_ref[...]                                              # [C, H]
    hst = hst_ref[...]                                            # [H, C]
    s0 = jnp.dot(q0 * k0, hs, preferred_element_type=jnp.float32)      # [Bblk, H]
    prod = (q0[:, None, :] * kr).reshape(bblk * hw, c)
    sr = jnp.dot(prod, hs,
                 preferred_element_type=jnp.float32).reshape(bblk, hw, num_heads)

    # Numerically stable softmax over the T = HW + 1 keys (token 0 + spatial).
    m = jnp.maximum(jnp.max(sr, axis=1), s0)                      # [Bblk, H]
    e0 = jnp.exp(s0 - m)                                          # [Bblk, H]
    er = jnp.exp(sr - m[:, None, :])                              # [Bblk, HW, H]
    inv = pl.reciprocal(e0 + jnp.sum(er, axis=1))                 # [Bblk, H]

    # Broadcast per-head weights back to channels; contract over tokens.
    e0f = jnp.dot(e0, hst, preferred_element_type=jnp.float32)             # [Bblk, C]
    erf = jnp.dot(er.reshape(bblk * hw, num_heads), hst,
                  preferred_element_type=jnp.float32).reshape(bblk, hw, c)
    invf = jnp.dot(inv, hst, preferred_element_type=jnp.float32)           # [Bblk, C]

    a0 = (e0f * v0 + jnp.sum(erf * vr, axis=1)) * invf            # [Bblk, C]

    # Output projection for token 0 only; dense (Bblk, Dout) store.
    y = jnp.dot(a0, wc_ref[...],
                preferred_element_type=jnp.float32) + bc_ref[...]
    out_ref[...] = y.astype(out_ref.dtype)


def attention_pool2d(x_nchw, pos_emb, w_qkv, b_qkv, w_c, b_c, num_heads, *, bblk=8):
    """x_nchw: [B, C, H, W]; pos_emb: [C, T]; w_qkv: [3C, C]; w_c: [Dout, C]."""
    b, c, hgt, wid = x_nchw.shape
    hw = hgt * wid
    ch = c // num_heads
    dout = w_c.shape[0]

    # Glue: layout only.
    # TODO(synk): at production resolutions fuse this NCHW->[B,HW,C] transpose
    # into the producer instead of paying a separate HBM pass.
    x_tok = jnp.transpose(x_nchw.reshape(b, c, hw), (0, 2, 1))     # [B, HW, C]
    bp = ((b + bblk - 1) // bblk) * bblk
    if bp != b:  # pad batch so the output block is sublane-dense (8 rows)
        x_tok = jnp.pad(x_tok, ((0, bp - b), (0, 0), (0, 0)))

    pos_t = pos_emb.T                                              # [T, C]
    pos0 = pos_t[0:1, :]                                           # [1, C]
    posr = pos_t[1:, :]                                            # [HW, C]

    wq_t = w_qkv[:c, :].T                                          # [C, C]
    wkv_t = w_qkv[c:, :].T                                         # [C, 2C]
    bq = b_qkv[:c].reshape(1, c)
    bkv = b_qkv[c:].reshape(1, 2 * c)
    wc_t = w_c.T                                                   # [C, Dout]
    bc = b_c.reshape(1, dout)

    # 0/1 head-membership matrix: hs[ci, h] = 1 iff channel ci belongs to head h.
    hs = (jnp.arange(c)[:, None] // ch ==
          jnp.arange(num_heads)[None, :]).astype(jnp.float32)      # [C, H]
    hst = hs.T                                                     # [H, C]

    kernel = functools.partial(_attention_pool_kernel, num_heads=num_heads)

    out = pl.pallas_call(
        kernel,
        out_shape=jax.ShapeDtypeStruct((bp, dout), x_nchw.dtype),
        grid=(bp // bblk,),
        in_specs=[
            pl.BlockSpec((bblk, hw, c), lambda i: (i, 0, 0)),      # x batch block
            pl.BlockSpec((1, c), lambda i: (0, 0)),                # pos token 0
            pl.BlockSpec((hw, c), lambda i: (0, 0)),               # pos spatial
            pl.BlockSpec((c, c), lambda i: (0, 0)),                # W_q^T
            pl.BlockSpec((1, c), lambda i: (0, 0)),                # b_q
            pl.BlockSpec((c, 2 * c), lambda i: (0, 0)),            # W_kv^T
            pl.BlockSpec((1, 2 * c), lambda i: (0, 0)),            # b_kv
            pl.BlockSpec((c, dout), lambda i: (0, 0)),             # W_c^T
            pl.BlockSpec((1, dout), lambda i: (0, 0)),             # b_c
            pl.BlockSpec((c, num_heads), lambda i: (0, 0)),        # head matrix
            pl.BlockSpec((num_heads, c), lambda i: (0, 0)),        # head matrix^T
        ],
        out_specs=pl.BlockSpec((bblk, dout), lambda i: (i, 0)),
        compiler_params=pltpu.CompilerParams(
            dimension_semantics=("parallel",)),
    )(x_tok, pos0, posr, wq_t, bq, wkv_t, bkv, wc_t, bc, hs, hst)
    return out[:b]


def reference_forward(x_nchw, pos_emb, w_qkv, b_qkv, w_c, b_c, num_heads):
    """Pure-JAX mirror of the PyTorch AttentionPool2d.forward (for validation)."""
    b, c, *_ = x_nchw.shape
    x = x_nchw.reshape(b, c, -1)
    x = jnp.concatenate([x.mean(axis=-1, keepdims=True), x], axis=-1)
    x = x + pos_emb[None, :, :]
    qkv = jnp.einsum('oc,bct->bot', w_qkv, x) + b_qkv[None, :, None]

    bs, width, length = qkv.shape
    ch = width // (3 * num_heads)
    q, k, v = jnp.split(qkv, 3, axis=1)
    scale = 1.0 / math.sqrt(math.sqrt(ch))
    qh = (q * scale).reshape(bs * num_heads, ch, length)
    kh = (k * scale).reshape(bs * num_heads, ch, length)
    vh = v.reshape(bs * num_heads, ch, length)
    weight = jnp.einsum('bct,bcs->bts', qh, kh)
    weight = jax.nn.softmax(weight.astype(jnp.float32), axis=-1)
    a = jnp.einsum('bts,bcs->bct', weight, vh).reshape(bs, -1, length)

    y = jnp.einsum('oc,bct->bot', w_c, a) + b_c[None, :, None]
    return y[:, :, 0]


if __name__ == "__main__":
    # Small shapes consistent with the module.
    B = 2
    SPACIAL_DIM = 4            # H = W = 4  -> T = 17
    EMBED_DIM = 32             # C
    NUM_HEAD_CHANNELS = 8      # -> num_heads = 4
    OUTPUT_DIM = 16

    num_heads = EMBED_DIM // NUM_HEAD_CHANNELS
    T = SPACIAL_DIM * SPACIAL_DIM + 1

    key = jax.random.PRNGKey(0)
    kx, kpos, kwq, kbq, kwc, kbc = jax.random.split(key, 6)

    x = jax.random.normal(kx, (B, EMBED_DIM, SPACIAL_DIM, SPACIAL_DIM), jnp.float32)

    # Deterministic parameter init (shapes from __init__; synthetic values).
    pos_emb = jax.random.normal(kpos, (EMBED_DIM, T), jnp.float32) / math.sqrt(EMBED_DIM)
    w_qkv = jax.random.normal(kwq, (3 * EMBED_DIM, EMBED_DIM), jnp.float32) * 0.05
    b_qkv = jax.random.normal(kbq, (3 * EMBED_DIM,), jnp.float32) * 0.05
    w_c = jax.random.normal(kwc, (OUTPUT_DIM, EMBED_DIM), jnp.float32) * 0.05
    b_c = jax.random.normal(kbc, (OUTPUT_DIM,), jnp.float32) * 0.05

    out = attention_pool2d(x, pos_emb, w_qkv, b_qkv, w_c, b_c, num_heads)
    out = jax.block_until_ready(out)

    ref = reference_forward(x, pos_emb, w_qkv, b_qkv, w_c, b_c, num_heads)
    ref = jax.block_until_ready(ref)

    assert out.shape == (B, OUTPUT_DIM), out.shape
    assert jnp.allclose(out, ref, atol=1e-4, rtol=1e-4), (
        f"max abs diff {jnp.max(jnp.abs(out - ref))}")

    print("KERNEL_OK")
</pallas_src>

<mosaic_0001>
module attributes {stable_mosaic.version = 11 : i64} {
  func.func @_attention_pool_kernel(%arg0: i32, %arg1: memref<8x16x32xf32, #tpu.memory_space<vmem>>, %arg2: memref<1x32xf32, #tpu.memory_space<vmem>>, %arg3: memref<16x32xf32, #tpu.memory_space<vmem>>, %arg4: memref<32x32xf32, #tpu.memory_space<vmem>>, %arg5: memref<1x32xf32, #tpu.memory_space<vmem>>, %arg6: memref<32x64xf32, #tpu.memory_space<vmem>>, %arg7: memref<1x64xf32, #tpu.memory_space<vmem>>, %arg8: memref<32x16xf32, #tpu.memory_space<vmem>>, %arg9: memref<1x16xf32, #tpu.memory_space<vmem>>, %arg10: memref<32x4xf32, #tpu.memory_space<vmem>>, %arg11: memref<4x32xf32, #tpu.memory_space<vmem>>, %arg12: memref<8x16xf32, #tpu.memory_space<vmem>>) attributes {dimension_semantics = [#tpu.dimension_semantics<parallel>], iteration_bounds = array<i64: 1>, scalar_prefetch = 0 : i64, scratch_operands = 0 : i64, tpu.core_type = #tpu.core_type<tc>, window_params = [{transform_indices = @transform_0, window_bounds = array<i64: 8, 16, 32>}, {pipeline_mode = #tpu.pipeline_mode<synchronous>, transform_indices = @transform_1, window_bounds = array<i64: 1, 32>}, {pipeline_mode = #tpu.pipeline_mode<synchronous>, transform_indices = @transform_2, window_bounds = array<i64: 16, 32>}, {pipeline_mode = #tpu.pipeline_mode<synchronous>, transform_indices = @transform_3, window_bounds = array<i64: 32, 32>}, {pipeline_mode = #tpu.pipeline_mode<synchronous>, transform_indices = @transform_4, window_bounds = array<i64: 1, 32>}, {pipeline_mode = #tpu.pipeline_mode<synchronous>, transform_indices = @transform_5, window_bounds = array<i64: 32, 64>}, {pipeline_mode = #tpu.pipeline_mode<synchronous>, transform_indices = @transform_6, window_bounds = array<i64: 1, 64>}, {pipeline_mode = #tpu.pipeline_mode<synchronous>, transform_indices = @transform_7, window_bounds = array<i64: 32, 16>}, {pipeline_mode = #tpu.pipeline_mode<synchronous>, transform_indices = @transform_8, window_bounds = array<i64: 1, 16>}, {pipeline_mode = #tpu.pipeline_mode<synchronous>, transform_indices = @transform_9, window_bounds = array<i64: 32, 4>}, {pipeline_mode = #tpu.pipeline_mode<synchronous>, transform_indices = @transform_10, window_bounds = array<i64: 4, 32>}, {transform_indices = @transform_11, window_bounds = array<i64: 8, 16>}]} {
    %c0 = arith.constant 0 : index
    %c0_0 = arith.constant 0 : index
    %c0_1 = arith.constant 0 : index
    %0 = vector.load %arg1[%c0, %c0_0, %c0_1] : memref<8x16x32xf32, #tpu.memory_space<vmem>>, vector<8x16x32xf32>
    %cst = arith.constant dense<0.000000e+00> : vector<8x32xf32>
    %1 = vector.multi_reduction <add>, %0, %cst [1] : vector<8x16x32xf32> to vector<8x32xf32>
    %cst_2 = arith.constant 1.600000e+01 : f32
    %2 = vector.broadcast %cst_2 : f32 to vector<8x32xf32>
    %3 = arith.divf %1, %2 : vector<8x32xf32>
    %c0_3 = arith.constant 0 : index
    %c0_4 = arith.constant 0 : index
    %4 = vector.load %arg2[%c0_3, %c0_4] : memref<1x32xf32, #tpu.memory_space<vmem>>, vector<1x32xf32>
    %5 = vector.broadcast %4 : vector<1x32xf32> to vector<8x32xf32>
    %6 = arith.addf %3, %5 : vector<8x32xf32>
    %c0_5 = arith.constant 0 : index
    %c0_6 = arith.constant 0 : index
    %7 = vector.load %arg3[%c0_5, %c0_6] : memref<16x32xf32, #tpu.memory_space<vmem>>, vector<16x32xf32>
    %8 = vector.shape_cast %7 : vector<16x32xf32> to vector<1x16x32xf32>
    %9 = vector.broadcast %8 : vector<1x16x32xf32> to vector<8x16x32xf32>
    %10 = arith.addf %0, %9 : vector<8x16x32xf32>
    %11 = vector.shape_cast %10 : vector<8x16x32xf32> to vector<128x32xf32>
    %c0_7 = arith.constant 0 : index
    %c0_8 = arith.constant 0 : index
    %12 = vector.load %arg4[%c0_7, %c0_8] : memref<32x32xf32, #tpu.memory_space<vmem>>, vector<32x32xf32>
    %cst_9 = arith.constant dense<0.000000e+00> : vector<8x32xf32>
    %13 = tpu.matmul %6, %12, %cst_9 {dimension_numbers = #tpu.dot_dimension_numbers<[1], [0], [0], [1], [0, 0, 1, 1], [], []>} : vector<8x32xf32>, vector<32x32xf32>, vector<8x32xf32> -> vector<8x32xf32>
    %c0_10 = arith.constant 0 : index
    %c0_11 = arith.constant 0 : index
    %14 = vector.load %arg5[%c0_10, %c0_11] : memref<1x32xf32, #tpu.memory_space<vmem>>, vector<1x32xf32>
    %15 = vector.broadcast %14 : vector<1x32xf32> to vector<8x32xf32>
    %16 = arith.addf %13, %15 : vector<8x32xf32>
    %cst_12 = arith.constant 0.353553385 : f32
    %17 = vector.broadcast %cst_12 : f32 to vector<8x32xf32>
    %18 = arith.mulf %16, %17 : vector<8x32xf32>
    %c0_13 = arith.constant 0 : index
    %c0_14 = arith.constant 0 : index
    %19 = vector.load %arg6[%c0_13, %c0_14] : memref<32x64xf32, #tpu.memory_space<vmem>>, vector<32x64xf32>
    %cst_15 = arith.constant dense<0.000000e+00> : vector<8x64xf32>
    %20 = tpu.matmul %6, %19, %cst_15 {dimension_numbers = #tpu.dot_dimension_numbers<[1], [0], [0], [1], [0, 0, 1, 1], [], []>} : vector<8x32xf32>, vector<32x64xf32>, vector<8x64xf32> -> vector<8x64xf32>
    %c0_16 = arith.constant 0 : index
    %c0_17 = arith.constant 0 : index
    %21 = vector.load %arg7[%c0_16, %c0_17] : memref<1x64xf32, #tpu.memory_space<vmem>>, vector<1x64xf32>
    %22 = vector.broadcast %21 : vector<1x64xf32> to vector<8x64xf32>
    %23 = arith.addf %20, %22 : vector<8x64xf32>
    %c0_18 = arith.constant 0 : index
    %c0_19 = arith.constant 0 : index
    %24 = vector.load %arg6[%c0_18, %c0_19] : memref<32x64xf32, #tpu.memory_space<vmem>>, vector<32x64xf32>
    %cst_20 = arith.constant dense<0.000000e+00> : vector<128x64xf32>
    %25 = tpu.matmul %11, %24, %cst_20 {dimension_numbers = #tpu.dot_dimension_numbers<[1], [0], [0], [1], [0, 0, 1, 1], [], []>} : vector<128x32xf32>, vector<32x64xf32>, vector<128x64xf32> -> vector<128x64xf32>
    %c0_21 = arith.constant 0 : index
    %c0_22 = arith.constant 0 : index
    %26 = vector.load %arg7[%c0_21, %c0_22] : memref<1x64xf32, #tpu.memory_space<vmem>>, vector<1x64xf32>
    %27 = vector.broadcast %26 : vector<1x64xf32> to vector<128x64xf32>
    %28 = arith.addf %25, %27 : vector<128x64xf32>
    %29 = vector.extract_strided_slice %23 {offsets = [0, 0], sizes = [8, 32], strides = [1, 1]} : vector<8x64xf32> to vector<8x32xf32>
    %30 = vector.extract_strided_slice %23 {offsets = [0, 32], sizes = [8, 32], strides = [1, 1]} : vector<8x64xf32> to vector<8x32xf32>
    %31 = vector.extract_strided_slice %28 {offsets = [0, 0], sizes = [128, 32], strides = [1, 1]} : vector<128x64xf32> to vector<128x32xf32>
    %32 = vector.shape_cast %31 : vector<128x32xf32> to vector<8x16x32xf32>
    %33 = vector.extract_strided_slice %28 {offsets = [0, 32], sizes = [128, 32], strides = [1, 1]} : vector<128x64xf32> to vector<128x32xf32>
    %34 = vector.shape_cast %33 : vector<128x32xf32> to vector<8x16x32xf32>
    %c0_23 = arith.constant 0 : index
    %c0_24 = arith.constant 0 : index
    %35 = vector.load %arg10[%c0_23, %c0_24] : memref<32x4xf32, #tpu.memory_space<vmem>>, vector<32x4xf32>
    %c0_25 = arith.constant 0 : index
    %c0_26 = arith.constant 0 : index
    %36 = vector.load %arg11[%c0_25, %c0_26] : memref<4x32xf32, #tpu.memory_space<vmem>>, vector<4x32xf32>
    %37 = arith.mulf %18, %29 : vector<8x32xf32>
    %cst_27 = arith.constant dense<0.000000e+00> : vector<8x4xf32>
    %38 = tpu.matmul %37, %35, %cst_27 {dimension_numbers = #tpu.dot_dimension_numbers<[1], [0], [0], [1], [0, 0, 1, 1], [], []>} : vector<8x32xf32>, vector<32x4xf32>, vector<8x4xf32> -> vector<8x4xf32>
    %39 = vector.shape_cast %18 : vector<8x32xf32> to vector<8x1x32xf32>
    %40 = vector.broadcast %39 : vector<8x1x32xf32> to vector<8x16x32xf32>
    %41 = arith.mulf %40, %32 : vector<8x16x32xf32>
    %42 = vector.shape_cast %41 : vector<8x16x32xf32> to vector<128x32xf32>
    %cst_28 = arith.constant dense<0.000000e+00> : vector<128x4xf32>
    %43 = tpu.matmul %42, %35, %cst_28 {dimension_numbers = #tpu.dot_dimension_numbers<[1], [0], [0], [1], [0, 0, 1, 1], [], []>} : vector<128x32xf32>, vector<32x4xf32>, vector<128x4xf32> -> vector<128x4xf32>
    %44 = vector.shape_cast %43 : vector<128x4xf32> to vector<8x16x4xf32>
    %cst_29 = arith.constant dense<0xFF800000> : vector<8x4xf32>
    %45 = vector.multi_reduction <maximumf>, %44, %cst_29 [1] : vector<8x16x4xf32> to vector<8x4xf32>
    %46 = arith.maximumf %45, %38 : vector<8x4xf32>
    %47 = arith.subf %38, %46 : vector<8x4xf32>
    %48 = math.exp %47 : vector<8x4xf32>
    %49 = vector.shape_cast %46 : vector<8x4xf32> to vector<8x1x4xf32>
    %50 = vector.broadcast %49 : vector<8x1x4xf32> to vector<8x16x4xf32>
    %51 = arith.subf %44, %50 : vector<8x16x4xf32>
    %52 = math.exp %51 : vector<8x16x4xf32>
    %cst_30 = arith.constant dense<0.000000e+00> : vector<8x4xf32>
    %53 = vector.multi_reduction <add>, %52, %cst_30 [1] : vector<8x16x4xf32> to vector<8x4xf32>
    %54 = arith.addf %48, %53 : vector<8x4xf32>
    %55 = tpu.reciprocal %54 : vector<8x4xf32> -> vector<8x4xf32>
    %cst_31 = arith.constant dense<0.000000e+00> : vector<8x32xf32>
    %56 = tpu.matmul %48, %36, %cst_31 {dimension_numbers = #tpu.dot_dimension_numbers<[1], [0], [0], [1], [0, 0, 1, 1], [], []>} : vector<8x4xf32>, vector<4x32xf32>, vector<8x32xf32> -> vector<8x32xf32>
    %57 = vector.shape_cast %52 : vector<8x16x4xf32> to vector<128x4xf32>
    %cst_32 = arith.constant dense<0.000000e+00> : vector<128x32xf32>
    %58 = tpu.matmul %57, %36, %cst_32 {dimension_numbers = #tpu.dot_dimension_numbers<[1], [0], [0], [1], [0, 0, 1, 1], [], []>} : vector<128x4xf32>, vector<4x32xf32>, vector<128x32xf32> -> vector<128x32xf32>
    %59 = vector.shape_cast %58 : vector<128x32xf32> to vector<8x16x32xf32>
    %cst_33 = arith.constant dense<0.000000e+00> : vector<8x32xf32>
    %60 = tpu.matmul %55, %36, %cst_33 {dimension_numbers = #tpu.dot_dimension_numbers<[1], [0], [0], [1], [0, 0, 1, 1], [], []>} : vector<8x4xf32>, vector<4x32xf32>, vector<8x32xf32> -> vector<8x32xf32>
    %61 = arith.mulf %56, %30 : vector<8x32xf32>
    %62 = arith.mulf %59, %34 : vector<8x16x32xf32>
    %cst_34 = arith.constant dense<0.000000e+00> : vector<8x32xf32>
    %63 = vector.multi_reduction <add>, %62, %cst_34 [1] : vector<8x16x32xf32> to vector<8x32xf32>
    %64 = arith.addf %61, %63 : vector<8x32xf32>
    %65 = arith.mulf %64, %60 : vector<8x32xf32>
    %c0_35 = arith.constant 0 : index
    %c0_36 = arith.constant 0 : index
    %66 = vector.load %arg8[%c0_35, %c0_36] : memref<32x16xf32, #tpu.memory_space<vmem>>, vector<32x16xf32>
    %cst_37 = arith.constant dense<0.000000e+00> : vector<8x16xf32>
    %67 = tpu.matmul %65, %66, %cst_37 {dimension_numbers = #tpu.dot_dimension_numbers<[1], [0], [0], [1], [0, 0, 1, 1], [], []>} : vector<8x32xf32>, vector<32x16xf32>, vector<8x16xf32> -> vector<8x16xf32>
    %c0_38 = arith.constant 0 : index
    %c0_39 = arith.constant 0 : index
    %68 = vector.load %arg9[%c0_38, %c0_39] : memref<1x16xf32, #tpu.memory_space<vmem>>, vector<1x16xf32>
    %69 = vector.broadcast %68 : vector<1x16xf32> to vector<8x16xf32>
    %70 = arith.addf %67, %69 : vector<8x16xf32>
    %c0_40 = arith.constant 0 : index
    %c0_41 = arith.constant 0 : index
    %71 = vector.load %arg12[%c0_40, %c0_41] : memref<8x16xf32, #tpu.memory_space<vmem>>, vector<8x16xf32>
    tpu.vector_store %arg12[%c0_40, %c0_41], %70 {strides = array<i32>} : memref<8x16xf32, #tpu.memory_space<vmem>>, vector<8x16xf32>,
    return
  }
  func.func @transform_0(%arg0: i32) -> (i32, i32, i32) {
    %c0_i32 = arith.constant 0 : i32
    %c0_i32_0 = arith.constant 0 : i32
    %c0_i32_1 = arith.constant 0 : i32
    return %arg0, %c0_i32, %c0_i32_0 : i32, i32, i32
  }
  func.func @transform_1(%arg0: i32) -> (i32, i32) {
    %c0_i32 = arith.constant 0 : i32
    %c0_i32_0 = arith.constant 0 : i32
    %c0_i32_1 = arith.constant 0 : i32
    return %c0_i32, %c0_i32_0 : i32, i32
  }
  func.func @transform_2(%arg0: i32) -> (i32, i32) {
    %c0_i32 = arith.constant 0 : i32
    %c0_i32_0 = arith.constant 0 : i32
    %c0_i32_1 = arith.constant 0 : i32
    return %c0_i32, %c0_i32_0 : i32, i32
  }
  func.func @transform_3(%arg0: i32) -> (i32, i32) {
    %c0_i32 = arith.constant 0 : i32
    %c0_i32_0 = arith.constant 0 : i32
    %c0_i32_1 = arith.constant 0 : i32
    return %c0_i32, %c0_i32_0 : i32, i32
  }
  func.func @transform_4(%arg0: i32) -> (i32, i32) {
    %c0_i32 = arith.constant 0 : i32
    %c0_i32_0 = arith.constant 0 : i32
    %c0_i32_1 = arith.constant 0 : i32
    return %c0_i32, %c0_i32_0 : i32, i32
  }
  func.func @transform_5(%arg0: i32) -> (i32, i32) {
    %c0_i32 = arith.constant 0 : i32
    %c0_i32_0 = arith.constant 0 : i32
    %c0_i32_1 = arith.constant 0 : i32
    return %c0_i32, %c0_i32_0 : i32, i32
  }
  func.func @transform_6(%arg0: i32) -> (i32, i32) {
    %c0_i32 = arith.constant 0 : i32
    %c0_i32_0 = arith.constant 0 : i32
    %c0_i32_1 = arith.constant 0 : i32
    return %c0_i32, %c0_i32_0 : i32, i32
  }
  func.func @transform_7(%arg0: i32) -> (i32, i32) {
    %c0_i32 = arith.constant 0 : i32
    %c0_i32_0 = arith.constant 0 : i32
    %c0_i32_1 = arith.constant 0 : i32
    return %c0_i32, %c0_i32_0 : i32, i32
  }
  func.func @transform_8(%arg0: i32) -> (i32, i32) {
    %c0_i32 = arith.constant 0 : i32
    %c0_i32_0 = arith.constant 0 : i32
    %c0_i32_1 = arith.constant 0 : i32
    return %c0_i32, %c0_i32_0 : i32, i32
  }
  func.func @transform_9(%arg0: i32) -> (i32, i32) {
    %c0_i32 = arith.constant 0 : i32
    %c0_i32_0 = arith.constant 0 : i32
    %c0_i32_1 = arith.constant 0 : i32
    return %c0_i32, %c0_i32_0 : i32, i32
  }
  func.func @transform_10(%arg0: i32) -> (i32, i32) {
    %c0_i32 = arith.constant 0 : i32
    %c0_i32_0 = arith.constant 0 : i32
    %c0_i32_1 = arith.constant 0 : i32
    return %c0_i32, %c0_i32_0 : i32, i32
  }
  func.func @transform_11(%arg0: i32) -> (i32, i32) {
    %c0_i32 = arith.constant 0 : i32
    %c0_i32_0 = arith.constant 0 : i32
    return %arg0, %c0_i32 : i32, i32
  }
}

</mosaic_0001>

<bundles_post_ra>
// kernel: tpu_custom_call.1
= control target key start
LH: loop header
LB: loop body
LE: loop exit
PB: predicated region body
PF: predicated region fallthrough
CT: control target
= control target key end

     0   :  { %16 = vsyncpa [#allocation3], 0  ;;  %s2922_s0 = inlined_call_operand.hbm [shape: f32[8,16,32], index: 0, kind: input, shape index: {}]   ;;  %s2923_s1 = inlined_call_operand.vmem [shape: f32[1,32], index: 1, kind: input, shape index: {}]   ;;  %s2924_s2 = inlined_call_operand.vmem [shape: f32[16,32], index: 2, kind: input, shape index: {}]   ;;  %s2925_s3 = inlined_call_operand.vmem [shape: f32[32,32], index: 3, kind: input, shape index: {}]   ;;  %s2926_s4 = inlined_call_operand.vmem [shape: f32[1,32], index: 4, kind: input, shape index: {}]   ;;  %s2927_s5 = inlined_call_operand.vmem [shape: f32[32,64], index: 5, kind: input, shape index: {}]   ;;  %s2928_s6 = inlined_call_operand.vmem [shape: f32[1,64], index: 6, kind: input, shape index: {}]   ;;  %s2929_s7 = inlined_call_operand.vmem [shape: f32[32,16], index: 7, kind: input, shape index: {}]   ;;  %s2930_s8 = inlined_call_operand.vmem [shape: f32[1,16], index: 8, kind: input, shape index: {}]   ;;  %s2931_s9 = inlined_call_operand.vmem [shape: f32[32,4], index: 9, kind: input, shape index: {}]   ;;  %s2932_s10 = inlined_call_operand.vmem [shape: f32[4,32], index: 10, kind: input, shape index: {}]   ;;  %s2933_s11 = inlined_call_operand.hbm [shape: f32[8,16], index: 11, kind: output, shape index: {}]  }
   0x1   :  { %17 = vsyncpa [#allocation4], 0  ;;  %s2280_s17 = smov [#allocation2]   ;;  %s2232_s21 = scalar_lea.hbm %s2922_s0, 2048 }
   0x2   :  { %s23_s18 = sshll.u32 %s2280_s17, 4  ;;  %p2233_p0 = scmp.ne.s32.totalorder %s2922_s0, %s2232_s21  ;;  %s24_s18 = int_to_ptr.vmem [resolvable:$true] %s23_s18 }
   0x3   :  { %p2236_p1 = scmp.lt.u32.totalorder %s2232_s21, %s2922_s0 }
   0x5   :  { %p2238_p2 = pnand %p2236_p1, %p2233_p0 }
   0x7   :  { %2241 = shalt.err (!%p2238_p2)
}
   0x8   :  { %s2242_s26 = scalar_lea.vmem %s24_s18, 2048  ;;  %p2247_p4 = scmp.lt.s32.totalorder %s24_s18, %s24_s18 }
   0x9   :  { %p2243_p3 = scmp.ne.s32.totalorder %s24_s18, %s2242_s26  ;;  %p2248_p5 = scmp.lt.s32.totalorder %s2242_s26, %s2242_s26 }
   0xb   :  { %p2249_p6 = por %p2248_p5, %p2247_p4 }
   0xd   :  { %p2250_p7 = pnand %p2249_p6, %p2243_p3 }
   0xf   :  { %2253 = shalt.err (!%p2250_p7)
}
  0x10   :  { %s2281_s27 = smov 128   ;;  %s2282_s28 = smov 8  }
  0x11   :  { %29 = dma.hbm_to_vmem [thread:$0]  %s2922_s0, 2048, %s24_s18, [#allocation3], %s2281_s27, %s2281_s27, %s2282_s28  }
  0x12   :  { %2276 = dma.done.wait [#allocation3], 2048  }
  0x13   :  { %2277 = vsyncadd [#allocation3], 4294965248  ;;  %v2283_v0 = vmov 0.0|0.0   ;;  %vm2284_vm0 = vmmov 0   ;;  %v2285_v1 = vmov 0.0   ;;  %v297_v2 = vld [vmem:[%s2927_s5] sm:$0xff] }
  0x14   :  { %2147 = vmatprep.subr.bf16.mxu1 %v2283_v0  ;;  %2011 = vmatprep.mubr.msk.f32.mxu1 %vm2284_vm0, %v2285_v1  ;;  %v298_v3 = vld [vmem:[%s2927_s5 + $0x8] sm:$0xff]  ;;  %v299_v4 = vld [vmem:[%s2927_s5 + $0x10] sm:$0xff]  ;;  %v300_v6 = vld [vmem:[%s2927_s5 + $0x18] sm:$0xff]  ;;  %vm69_vm1 = vcmask 261120   ;;  %vm204_vm2 = vcmask 1041409   ;;  %vm207_vm3 = vcmask 1042434  }
  0x15   :  { %v2373_v5 = vpack.c.bf16 %v298_v3, %v297_v2  ;;  %v53_v7 = vld [vmem:[#allocation2] sm:$0xff]  ;;  %v54_v8 = vld [vmem:[#allocation2 + $0x8] sm:$0xff]  ;;  %v2378_v9 = vpack.c.bf16 %v300_v6, %v299_v4  ;;  %v55_v16 = vld [vmem:[#allocation2 + $0x10] sm:$0xff]  ;;  %vm210_vm4 = vcmask 1043459   ;;  %vm213_vm5 = vcmask 1044484   ;;  %s2286_s19 = smov 96  }
  0x16   :  { %v70_v10 = vsel %vm69_vm1, %v53_v7, 0.0  ;;  %v71_v11 = vsel %vm69_vm1, %v54_v8, 0.0  ;;  %v2385_v12 = vld [vmem:[%s2924_s2] sm:$0xff]  ;;  %v2390_v13 = vld [vmem:[%s2924_s2 + $0x8] sm:$0xff]  ;;  %v56_v17 = vld [vmem:[#allocation2 + $0x18] sm:$0xff]  ;;  %v79_v20 = vsel %vm69_vm1, %v55_v16, 0.0 }
  0x17   :  { %2160 = vmatprep.subr.bf16.mxu0 %v2373_v5  ;;  %v72_v14 = vadd.f32 %v71_v11, %v70_v10  ;;  %v168_v15 = vadd.f32 %v2385_v12, %v53_v7  ;;  %v57_v18 = vld [vmem:[#allocation2 + $0x20] sm:$0xff]  ;;  %v169_v19 = vadd.f32 %v2390_v13, %v54_v8  ;;  %v170_v21 = vadd.f32 %v2385_v12, %v55_v16  ;;  %v58_v23 = vld [vmem:[#allocation2 + $0x28] sm:$0xff]  ;;  %v59_v30 = vld [vmem:[#allocation2 + $0x30] sm:$0xff]  ;;  %s2288_s27 = smov [#allocation5]  }
  0x18   :  { %2162 = vmatpush3.bf16.msra.mxu0 %v2373_v5  ;;  %v80_v22 = vsel %vm69_vm1, %v56_v17, 0.0  ;;  %v184_v24 = vld [vmem:[%s2925_s3] sm:$0xff]  ;;  %v185_v25 = vld [vmem:[%s2925_s3 + $0x8] sm:$0xff]  ;;  %v171_v28 = vadd.f32 %v2390_v13, %v56_v17  ;;  %v88_v29 = vsel %vm69_vm1, %v57_v18, 0.0  ;;  %v60_v31 = vld [vmem:[#allocation2 + $0x38] sm:$0xff]  ;;  %v172_v33 = vadd.f32 %v2385_v12, %v57_v18  ;;  %s1852_s28 = sshll.u32 %s2288_s27, 4  ;;  %s1853_s28 = int_to_ptr.vmem [resolvable:$true] %s1852_s28 }
  0x19   :  { %2164 = vmatprep.subr.bf16.mxu0 %v2378_v9  ;;  %v73_v26 = vrot.slane %v72_v14, 4  ;;  %2033 = vmatprep.mubr.msk.f32.mxu0 %vm69_vm1, %v168_v15  ;;  %v81_v27 = vadd.f32 %v80_v22, %v79_v20  ;;  %v186_v32 = vld [vmem:[%s2925_s3 + $0x10] sm:$0xff]  ;;  %v89_v34 = vsel %vm69_vm1, %v58_v23, 0.0  ;;  %v2148_v35 = vpack.c.bf16 %v185_v25, %v184_v24  ;;  %v187_v37 = vld [vmem:[%s2925_s3 + $0x18] sm:$0xff]  ;;  %v61_v38 = vld [vmem:[#allocation2 + $0x40] sm:$0xff]  ;;  %s2254_s3 = scalar_lea.vmem %s1853_s28, 128  ;;  %p2259_p9 = scmp.lt.s32.totalorder %s1853_s28, %s1853_s28 }
  0x1a   :  { %v97_v36 = vsel %vm69_vm1, %v59_v30, 0.0  ;;  %v90_v41 = vadd.f32 %v89_v34, %v88_v29  ;;  %v2419_v42 = vadd.f32 %v2390_v13, %v58_v23  ;;  %v2421_v43 = vld [vmem:[#allocation2 + $0x48] sm:$0xff]  ;;  %v2423_v44 = vld [vmem:[#allocation2 + $0x50] sm:$0xff]  ;;  %v2427_v45 = vadd.f32 %v2385_v12, %v59_v30  ;;  %v2432_v53 = vld [vmem:[#allocation2 + $0x58] sm:$0xff]  ;;  %p2255_p8 = scmp.ne.s32.totalorder %s1853_s28, %s2254_s3  ;;  %p2260_p10 = scmp.lt.s32.totalorder %s2254_s3, %s2254_s3 }
  0x1b   :  { %v74_v39 = vadd.f32 %v73_v26, %v72_v14  ;;  %v82_v40 = vrot.slane %v81_v27, 4  ;;  %2149 = vmatpush3.bf16.msra.mxu1 %v2148_v35  ;;  %v98_v46 = vsel %vm69_vm1, %v60_v31, 0.0  ;;  %v2151_v47 = vpack.c.bf16 %v187_v37, %v186_v32  ;;  %v2434_v54 = vld [vmem:[#allocation2 + $0x60] sm:$0xff]  ;;  %v2436_v55 = vld [vmem:[#allocation2 + $0x68] sm:$0xff]  ;;  %v2450_v2 = vld [vmem:[#allocation2 + $0x70] sm:$0xff] }
  0x1c   :  { %2166 = vmatpush3.bf16.msra.mxu0 %v2378_v9  ;;  %v106_v48 = vsel %vm69_vm1, %v61_v38, 0.0  ;;  %v91_v51 = vrot.slane %v90_v41, 4  ;;  %v99_v52 = vadd.f32 %v98_v46, %v97_v36  ;;  %2150 = vmatprep.subr.bf16.mxu1 %v2283_v0  ;;  %v2440_v56 = vadd.f32 %v2390_v13, %v60_v31  ;;  %v2460_v15 = vld [vmem:[#allocation2 + $0x78] sm:$0xff]  ;;  %v2471_v34 = vld [vmem:[%s2923_s1] ss:$0 sm:$0xff]  ;;  %p2261_p11 = por %p2260_p10, %p2259_p9 }
  0x1d   :  { %v75_v49 = vrot.slane %v74_v39, 2  ;;  %v83_v50 = vadd.f32 %v82_v40, %v81_v27  ;;  %2100 = vmatprep.subr.mxu0 %v2285_v1  ;;  %v2443_v57 = vadd.f32 %v2385_v12, %v61_v38  ;;  %v107_v58 = vsel %vm69_vm1, %v2421_v43, 0.0 }
  0x1e   :  { %v115_v59 = vsel %vm69_vm1, %v2423_v44, 0.0  ;;  %v92_v62 = vadd.f32 %v91_v51, %v90_v41  ;;  %v100_v63 = vrot.slane %v99_v52, 4  ;;  %v108_v3 = vadd.f32 %v107_v58, %v106_v48  ;;  %p2262_p12 = pnand %p2261_p11, %p2255_p8 }
  0x1f   :  { %v76_v60 = vadd.f32 %v75_v49, %v74_v39  ;;  %2034 = vmatmul.mubr.msk.f32.vlgmr.msra.gmra.mrb[0].mxu0 %vm69_vm1, %v169_v19  ;;  %v84_v61 = vrot.slane %v83_v50, 2  ;;  %2152 = vmatpush3.bf16.msra.mxu1 %v2151_v47  ;;  %v116_v4 = vsel %vm69_vm1, %v2432_v53, 0.0  ;;  %v124_v6 = vsel %vm69_vm1, %v2434_v54, 0.0 }
  0x20   :  { %2036 = vmatprep.mubr.msk.f32.mxu0 %vm69_vm1, %v170_v21  ;;  %v125_v7 = vsel %vm69_vm1, %v2436_v55, 0.0  ;;  %v93_v11 = vrot.slane %v92_v62, 2  ;;  %v101_v14 = vadd.f32 %v100_v63, %v99_v52  ;;  %2153 = vmatprep.subr.bf16.mxu1 %v2283_v0  ;;  %v109_v16 = vrot.slane %v108_v3, 4 }
  0x21   :  { %v77_v8 = vrot.slane %v76_v60, 1  ;;  %v85_v10 = vadd.f32 %v84_v61, %v83_v50  ;;  %v117_v17 = vadd.f32 %v116_v4, %v115_v59  ;;  %v126_v18 = vadd.f32 %v125_v7, %v124_v6 }
  0x22   :  { %v133_v19 = vsel %vm69_vm1, %v2450_v2, 0.0  ;;  %v94_v22 = vadd.f32 %v93_v11, %v92_v62  ;;  %v102_v23 = vrot.slane %v101_v14, 2  ;;  %v110_v24 = vadd.f32 %v109_v16, %v108_v3 }
  0x23   :  { %v78_v20 = vadd.f32 %v77_v8, %v76_v60  ;;  %v86_v21 = vrot.slane %v85_v10, 1  ;;  %2037 = vmatmul.mubr.msk.f32.gmra.mrb[2].mxu0 %vm69_vm1, %v171_v28  ;;  %v118_v25 = vrot.slane %v117_v17, 4  ;;  %v127_v26 = vrot.slane %v126_v18, 4 }
  0x24   :  { %2039 = vmatprep.mubr.msk.f32.mxu0 %vm69_vm1, %v172_v33  ;;  %v134_v27 = vsel %vm69_vm1, %v2460_v15, 0.0  ;;  %v95_v31 = vrot.slane %v94_v22, 1  ;;  %v103_v32 = vadd.f32 %v102_v23, %v101_v14  ;;  %v111_v28 = vrot.slane %v110_v24, 2 }
  0x25   :  { %v143_v29 = vmul.f32 0.0625, %v78_v20  ;;  %v87_v30 = vadd.f32 %v86_v21, %v85_v10  ;;  %v119_v35 = vadd.f32 %v118_v25, %v117_v17  ;;  %v128_v36 = vadd.f32 %v127_v26, %v126_v18 }
  0x26   :  { %v135_v33 = vadd.f32 %v134_v27, %v133_v19  ;;  %v96_v38 = vadd.f32 %v95_v31, %v94_v22  ;;  %v104_v39 = vrot.slane %v103_v32, 1  ;;  %v177_v40 = vadd.f32 %v2390_v13, %v2421_v43 }
  0x27   :  { %v144_v37 = vmul.f32 0.0625, %v87_v30  ;;  %2040 = vmatmul.mubr.msk.f32.gmra.mrb[4].mxu0 %vm69_vm1, %v2419_v42  ;;  %v112_v41 = vadd.f32 %v111_v28, %v110_v24  ;;  %v120_v46 = vrot.slane %v119_v35, 2  ;;  %v129_v47 = vrot.slane %v128_v36, 2 }
  0x28   :  { %2042 = vmatprep.mubr.msk.f32.mxu0 %vm69_vm1, %v2427_v45  ;;  %v136_v48 = vrot.slane %v135_v33, 4  ;;  %v158_v49 = vadd.f32 %v2471_v34, %v143_v29  ;;  %v145_v51 = vmul.f32 0.0625, %v96_v38  ;;  %v105_v52 = vadd.f32 %v104_v39, %v103_v32 }
  0x29   :  { %v159_v50 = vadd.f32 %v2471_v34, %v144_v37  ;;  %v113_v58 = vrot.slane %v112_v41, 1  ;;  %v121_v59 = vadd.f32 %v120_v46, %v119_v35  ;;  %v130_v42 = vadd.f32 %v129_v47, %v128_v36  ;;  %v2552_v37 = vld [vmem:[%s2928_s6] ss:$0 sm:$0xff] }
  0x2a   :  { %v137_v60 = vadd.f32 %v136_v48, %v135_v33  ;;  %v160_v43 = vadd.f32 %v2471_v34, %v145_v51  ;;  %v146_v62 = vmul.f32 0.0625, %v105_v52  ;;  %v178_v45 = vadd.f32 %v2385_v12, %v2423_v44 }
  0x2b   :  { %v203_v61 = vrot.slane %v159_v50, 7  ;;  %2043 = vmatmul.mubr.msk.f32.gmra.mrb[6].mxu0 %vm69_vm1, %v2440_v56  ;;  %v114_v63 = vadd.f32 %v113_v58, %v112_v41  ;;  %v122_v3 = vrot.slane %v121_v59, 1  ;;  %v131_v4 = vrot.slane %v130_v42, 1 }
  0x2c   :  { %2045 = vmatprep.mubr.msk.f32.mxu0 %vm69_vm1, %v2443_v57  ;;  %v138_v6 = vrot.slane %v137_v60, 2  ;;  %v161_v7 = vadd.f32 %v2471_v34, %v146_v62  ;;  %v206_v10 = vrot.slane %v160_v43, 6  ;;  %v179_v57 = vadd.f32 %v2390_v13, %v2432_v53 }
  0x2d   :  { %v205_v8 = vsel %vm204_vm2, %v203_v61, %v158_v49  ;;  %v147_v11 = vmul.f32 0.0625, %v114_v63  ;;  %v123_v14 = vadd.f32 %v122_v3, %v121_v59  ;;  %v132_v16 = vadd.f32 %v131_v4, %v130_v42 }
  0x2e   :  { %v139_v56 = vadd.f32 %v138_v6, %v137_v60  ;;  %v208_v44 = vsel %vm207_vm3, %v206_v10, %v205_v8  ;;  %v209_v17 = vrot.slane %v161_v7, 5  ;;  %v180_v18 = vadd.f32 %v2385_v12, %v2434_v54 }
  0x2f   :  { %2046 = vmatmul.mubr.msk.f32.gmra.mrb[8].mxu0 %vm69_vm1, %v177_v40  ;;  %v148_v20 = vmul.f32 0.0625, %v123_v14  ;;  %v149_v21 = vmul.f32 0.0625, %v132_v16  ;;  %v162_v22 = vadd.f32 %v2471_v34, %v147_v11  ;;  %vm216_vm6 = vcmask 1045509  }
  0x30   :  { %v140_v19 = vrot.slane %v139_v56, 1  ;;  %2048 = vmatprep.mubr.msk.f32.mxu0 %vm69_vm1, %v178_v45  ;;  %v211_v23 = vsel %vm210_vm4, %v209_v17, %v208_v44  ;;  %vm219_vm7 = vcmask 1046534   ;;  %v181_v53 = vadd.f32 %v2390_v13, %v2436_v55  ;;  %v1862_v17 = vld [vmem:[%s2926_s4] ss:$0 sm:$0xff] }
  0x31   :  { %v163_v25 = vadd.f32 %v2471_v34, %v148_v20  ;;  %v164_v26 = vadd.f32 %v2471_v34, %v149_v21  ;;  %v212_v27 = vrot.slane %v162_v22, 4  ;;  %v182_v54 = vadd.f32 %v2385_v12, %v2450_v2 }
  0x32   :  { %v141_v24 = vadd.f32 %v140_v19, %v139_v56  ;;  %vm222_vm8 = vcmask 1047559   ;;  %v183_v55 = vadd.f32 %v2390_v13, %v2460_v15  ;;  %v572_v13 = vld [vmem:[%s2931_s9 + $0x8] sm:$0xff]  ;;  %v2287_v4 = vmov 1966171168  }
  0x33   :  { %2049 = vmatmul.mubr.msk.f32.gmra.mrb[10].mxu0 %vm69_vm1, %v179_v57  ;;  %v214_v30 = vsel %vm213_vm5, %v212_v27, %v211_v23  ;;  %v215_v31 = vrot.slane %v163_v25, 3  ;;  %v218_v32 = vrot.slane %v164_v26, 2  ;;  %v653_v6 = vunpack.c.l.s4 %v2287_v4 }
  0x34   :  { %v150_v29 = vmul.f32 0.0625, %v141_v24  ;;  %2051 = vmatprep.mubr.msk.f32.mxu0 %vm69_vm1, %v180_v18  ;;  %v655_v7 = vlaneseq  ;;  %vm1245_vm9 = vcmask 1043456   ;;  %vm949_vm10 = vcmask 31744  }
  0x35   :  { %v217_v35 = vsel %vm216_vm6, %v215_v31, %v214_v30  ;;  %v654_v14 = vunpack.c.0.s8 %v653_v6  ;;  %vm1844_vm11 = vcmask 130048  }
  0x36   :  { %v165_v28 = vadd.f32 %v2471_v34, %v150_v29  ;;  %v220_v36 = vsel %vm219_vm7, %v218_v32, %v217_v35  ;;  %v574_v34 = vld [vmem:[%s2931_s9 + $0x18] sm:$0xff]  ;;  %v656_v16 = vshrl.u32 %v655_v7, 7 }
  0x37   :  { %2052 = vmatmul.mubr.msk.f32.gmra.mrb[12].mxu0 %vm69_vm1, %v181_v53 }
  0x38   :  { %v221_v12 = vrot.slane %v165_v28, 1  ;;  %2054 = vmatprep.mubr.msk.f32.mxu0 %vm69_vm1, %v182_v54  ;;  %v657_v21 = vsub.s32 %v654_v14, %v656_v16  ;;  %v2618_v29 = vsub.s32 0, %v656_v16 }
  0x3a   :  { %v223_v2 = vsel %vm222_vm8, %v221_v12, %v220_v36 }
  0x3b   :  { %2012 = vmatmul.mubr.msk.f32.vlgmr.msra.gmra.mrb[0].mxu1 %vm69_vm1, %v223_v2  ;;  %2055 = vmatmul.mubr.msk.f32.gmra.mrb[14].mxu0 %vm69_vm1, %v183_v55 }
  0x3c   :  { %2155 = vmatpush3.bf16.msra.mxu1 %v2373_v5  ;;  %2022 = vmatprep.mubr.msk.f32.mxu1 %vm2284_vm0, %v2285_v1  ;;  %v571_v5 = vld [vmem:[%s2931_s9] sm:$0xff] }
  0x3d   :  { %2156 = vmatprep.subr.bf16.mxu1 %v2283_v0  ;;  %2102 = vmatprep.mubr.msk.f32.mxu0 %vm2284_vm0, %v2285_v1  ;;  %v2535_v15 = vpack.c.bf16 %v572_v13, %v571_v5 }
  0x40   :  { %2158 = vmatpush3.bf16.msra.mxu1 %v2378_v9  ;;  %v573_v9 = vld [vmem:[%s2931_s9 + $0x10] sm:$0xff] }
  0x41   :  { %2167 = vmatprep.subr.bf16.mxu1 %v2283_v0  ;;  %v2545_v33 = vpack.c.bf16 %v574_v34, %v573_v9 }
  0x43   :  { %2023 = vmatmul.mubr.msk.f32.vlgmr.msra.gmra.mrb[2].mxu1 %vm69_vm1, %v223_v2 }
  0x44   :  { %2065 = vmatprep.mubr.msk.f32.mxu1 %vm2284_vm0, %v2285_v1  ;;  %2169 = vmatpush3.bf16.msra.mxu1 %v2535_v15 }
  0x45   :  { %2170 = vmatprep.subr.bf16.mxu1 %v2283_v0 }
  0x48   :  { %2172 = vmatpush3.bf16.msra.mxu1 %v2545_v33 }
  0x49   :  { %2174 = vmatprep.subr.bf16.mxu1 %v2535_v15 }
  0xf2   :  { %v2035_v38 = vpop.f32.mrb[0].mxu0 }
  0xf3   :  { %v2555_v39 = vadd.f32 %v2035_v38, %v2552_v37  ;;  %v492_v40 = vpop.f32.mrb[1].mxu0 }
  0xf4   :  { %v2560_v41 = vadd.f32 %v2552_v37, %v492_v40 }
  0xf5   :  { %1608 = vrot.lane.b32.xlu0 %v2555_v39, %s2286_s19 }
  0xf6   :  { %v2038_v46 = vpop.f32.mrb[2].mxu0 }
  0xf7   :  { %v2563_v47 = vadd.f32 %v2038_v46, %v2552_v37  ;;  %v502_v48 = vpop.f32.mrb[3].mxu0 }
  0xf8   :  { %v2570_v50 = vadd.f32 %v2552_v37, %v502_v48 }
  0xf9   :  { %1606 = vrot.lane.b32.xlu0 %v2560_v41, %s2286_s19  ;;  %1612 = vrot.lane.b32.xlu1 %v2563_v47, %s2286_s19 }
  0xfa   :  { %v2041_v49 = vpop.f32.mrb[4].mxu0 }
  0xfb   :  { %v512_v51 = vpop.f32.mrb[5].mxu0  ;;  %v2580_v59 = vadd.f32 %v2041_v49, %v2552_v37 }
  0xfc   :  { %v2573_v52 = vadd.f32 %v2552_v37, %v512_v51 }
  0xfd   :  { %1610 = vrot.lane.b32.xlu1 %v2570_v50, %s2286_s19 }
  0xfe   :  { %v2044_v58 = vpop.f32.mrb[6].mxu0  ;;  %1614 = vrot.lane.b32.xlu0 %v2573_v52, %s2286_s19 }
  0xff   :  { %v522_v42 = vpop.f32.mrb[7].mxu0  ;;  %v2590_v43 = vadd.f32 %v2044_v58, %v2552_v37 }
 0x100   :  { %v2583_v60 = vadd.f32 %v2552_v37, %v522_v42 }
 0x101   :  { %1616 = vrot.lane.b32.xlu1 %v2580_v59, %s2286_s19 }
 0x102   :  { %v2047_v61 = vpop.f32.mrb[8].mxu0  ;;  %1618 = vrot.lane.b32.xlu0 %v2583_v60, %s2286_s19 }
 0x103   :  { %v532_v62 = vpop.f32.mrb[9].mxu0  ;;  %v2600_v3 = vadd.f32 %v2047_v61, %v2552_v37 }
 0x104   :  { %v2593_v45 = vadd.f32 %v2552_v37, %v532_v62 }
 0x105   :  { %1620 = vrot.lane.b32.xlu1 %v2590_v43, %s2286_s19 }
 0x106   :  { %v2050_v63 = vpop.f32.mrb[10].mxu0  ;;  %1622 = vrot.lane.b32.xlu0 %v2593_v45, %s2286_s19 }
 0x107   :  { %v542_v8 = vpop.f32.mrb[11].mxu0  ;;  %v548_v56 = vadd.f32 %v2050_v63, %v2552_v37 }
 0x108   :  { %v543_v10 = vadd.f32 %v2552_v37, %v542_v8 }
 0x109   :  { %1624 = vrot.lane.b32.xlu1 %v2600_v3, %s2286_s19 }
 0x10a   :  { %v2053_v11 = vpop.f32.mrb[12].mxu0  ;;  %1626 = vrot.lane.b32.xlu0 %v543_v10, %s2286_s19 }
 0x10b   :  { %v552_v44 = vpop.f32.mrb[13].mxu0  ;;  %v558_v23 = vadd.f32 %v2053_v11, %v2552_v37 }
 0x10c   :  { %v553_v57 = vadd.f32 %v2552_v37, %v552_v44 }
 0x10d   :  { %1628 = vrot.lane.b32.xlu1 %v548_v56, %s2286_s19 }
 0x10e   :  { %v292_v18 = vpop.f32.mrb[0].mxu1  ;;  %v2056_v19 = vpop.f32.mrb[14].mxu0  ;;  %1630 = vrot.lane.b32.xlu0 %v553_v57, %s2286_s19 }
 0x10f   :  { %v293_v20 = vadd.f32 %v1862_v17, %v292_v18  ;;  %v2013_v22 = vpop.f32.mrb[1].mxu1  ;;  %v562_v24 = vpop.f32.mrb[15].mxu0  ;;  %v568_v54 = vadd.f32 %v2056_v19, %v2552_v37 }
 0x110   :  { %v563_v25 = vadd.f32 %v2552_v37, %v562_v24 }
 0x111   :  { %v296_v26 = vmul.f32 0.35355338, %v293_v20  ;;  %1632 = vrot.lane.b32.xlu1 %v558_v23, %s2286_s19 }
 0x112   :  { %1634 = vrot.lane.b32.xlu0 %v563_v25, %s2286_s19 }
 0x113   :  { %v651_v27 = vcombine.high %v296_v26, %v296_v26  ;;  %v658_v53 = vrot.slane %v296_v26, %v657_v21 }
 0x115   :  { %v665_v30 = vrot.slane %v651_v27, %v657_v21  ;;  %v666_v31 = vcombine.high %v658_v53, %v658_v53  ;;  %v674_v32 = vrot.slane %v658_v53, %v657_v21  ;;  %1636 = vrot.lane.b32.xlu1 %v568_v54, %s2286_s19 }
 0x116   :  { %v374_v28 = vpop.f32.mrb[2].mxu1 }
 0x117   :  { %v688_v35 = vrot.slane %v666_v31, %v657_v21  ;;  %v696_v36 = vcombine.high %v674_v32, %v674_v32  ;;  %v667_v55 = vcombine.high %v665_v30, %v665_v30  ;;  %v681_v12 = vrot.slane %v665_v30, %v657_v21  ;;  %v2024_v2 = vpop.f32.mrb[3].mxu1 }
 0x118   :  { %v375_v5 = vadd.f32 %v2552_v37, %v374_v28  ;;  %v703_v13 = vrot.slane %v674_v32, %v2618_v29 }
 0x119   :  { %v695_v9 = vrot.slane %v667_v55, %v657_v21  ;;  %v697_v34 = vcombine.high %v681_v12, %v681_v12  ;;  %v707_v38 = vrot.slane %v688_v35, %v2618_v29  ;;  %v711_v40 = vrot.slane %v696_v36, %v2618_v29 }
 0x11a   :  { %v576_v46 = vmul.f32 %v375_v5, %v296_v26  ;;  %v740_v48 = vmul.f32 %v703_v13, %v2560_v41  ;;  %v741_v49 = vmul.f32 %v703_v13, %v2555_v39  ;;  %1586 = vrot.lane.b32.xlu0 %v375_v5, %s2286_s19  ;;  %v698_v51 = vcombine.high %v688_v35, %v688_v35 }
 0x11b   :  { %v723_v58 = vrot.slane %v695_v9, %v2618_v29  ;;  %v727_v37 = vrot.slane %v697_v34, %v2618_v29  ;;  %v699_v42 = vcombine.high %v695_v9, %v695_v9  ;;  %v742_v61 = vmul.f32 %v707_v38, %v2570_v50 }
 0x11c   :  { %2066 = vmatmul.mubr.msk.f32.vlgmr.msra.gmra.mrb[4].mxu1 %vm69_vm1, %v576_v46  ;;  %v743_v62 = vmul.f32 %v707_v38, %v2563_v47  ;;  %v744_v63 = vmul.f32 %v711_v40, %v2573_v52  ;;  %v745_v41 = vmul.f32 %v711_v40, %v2580_v59  ;;  %v715_v39 = vrot.slane %v698_v51, %v2618_v29 }
 0x11d   :  { %v751_v4 = vmul.f32 %v723_v58, %v548_v56  ;;  %v750_v6 = vmul.f32 %v723_v58, %v543_v10  ;;  %v753_v7 = vmul.f32 %v727_v37, %v558_v23  ;;  %v752_v8 = vmul.f32 %v727_v37, %v553_v57  ;;  %2176 = vmatpush3.bf16.msra.mxu1 %v2535_v15 }
 0x11e   :  { %v731_v11 = vrot.slane %v699_v42, %v2618_v29  ;;  %2076 = vmatprep.mubr.msk.f32.mxu1 %vm69_vm1, %v740_v48  ;;  %2178 = vmatprep.subr.bf16.mxu1 %v2545_v33  ;;  %v746_v47 = vmul.f32 %v715_v39, %v2583_v60  ;;  %v747_v50 = vmul.f32 %v715_v39, %v2590_v43 }
 0x11f   :  { %v719_v52 = vrot.slane %v681_v12, %v2618_v29 }
 0x120   :  { %v755_v59 = vmul.f32 %v731_v11, %v568_v54  ;;  %v754_v14 = vmul.f32 %v731_v11, %v563_v25 }
 0x121   :  { %2180 = vmatpush3.bf16.msra.mxu1 %v2545_v33  ;;  %v748_v10 = vmul.f32 %v719_v52, %v2593_v45  ;;  %v749_v15 = vmul.f32 %v719_v52, %v2600_v3  ;;  %v2667_v33 = vld [vmem:[%s2932_s10] sm:$0xf] }
 0x122   :  { %2131 = vmatprep.subr.mxu1 %v2285_v1  ;;  %2101 = vmatpush3.msk.msra.mxu0 %vm1245_vm9, %v2667_v33 }
 0x123   :  { %2105 = vmatprep.subr.msk.mxu0 %vm1245_vm9, %v2667_v33 }
 0x124   :  { %2077 = vmatmul.mubr.msk.f32.vlgmr.msra.gmra.mrb[6].mxu1 %vm69_vm1, %v741_v49 }
 0x125   :  { %2079 = vmatprep.mubr.msk.f32.mxu1 %vm69_vm1, %v742_v61  ;;  %2132 = vmatpush3.msk.msra.mxu1 %vm1245_vm9, %v2667_v33 }
 0x126   :  { %2181 = vmatprep.subr.bf16.mxu1 %v2283_v0 }
 0x128   :  { %2080 = vmatmul.mubr.msk.f32.gmra.mrb[8].mxu1 %vm69_vm1, %v743_v62 }
 0x129   :  { %2082 = vmatprep.mubr.msk.f32.mxu1 %vm69_vm1, %v744_v63 }
 0x12c   :  { %2083 = vmatmul.mubr.msk.f32.gmra.mrb[10].mxu1 %vm69_vm1, %v745_v41 }
 0x12d   :  { %2085 = vmatprep.mubr.msk.f32.mxu1 %vm69_vm1, %v746_v47 }
 0x130   :  { %2086 = vmatmul.mubr.msk.f32.gmra.mrb[12].mxu1 %vm69_vm1, %v747_v50 }
 0x131   :  { %2088 = vmatprep.mubr.msk.f32.mxu1 %vm69_vm1, %v748_v10 }
 0x134   :  { %2089 = vmatmul.mubr.msk.f32.gmra.mrb[14].mxu1 %vm69_vm1, %v749_v15 }
 0x135   :  { %2091 = vmatprep.mubr.msk.f32.mxu1 %vm69_vm1, %v750_v6 }
 0x138   :  { %2092 = vmatmul.mubr.msk.f32.gmra.mrb[16].mxu1 %vm69_vm1, %v751_v4 }
 0x139   :  { %2094 = vmatprep.mubr.msk.f32.mxu1 %vm69_vm1, %v752_v8 }
 0x13c   :  { %2095 = vmatmul.mubr.msk.f32.gmra.mrb[18].mxu1 %vm69_vm1, %v753_v7 }
 0x13d   :  { %2097 = vmatprep.mubr.msk.f32.mxu1 %vm69_vm1, %v754_v14 }
 0x140   :  { %2098 = vmatmul.mubr.msk.f32.gmra.mrb[20].mxu1 %vm69_vm1, %v755_v59 }
 0x141   :  { %2133 = vmatprep.mubr.msk.f32.mxu1 %vm2284_vm0, %v2285_v1 }
 0x1ef   :  { %v2676_v60 = vpop.f32.mrb[4].mxu1 }
 0x1f0   :  { %v2067_v43 = vpop.f32.mrb[5].mxu1  ;;  %v1023_v58 = vrot.slane %v2676_v60, 1  ;;  %v1024_v39 = vrot.slane %v2676_v60, 2  ;;  %v1025_v4 = vrot.slane %v2676_v60, 3 }
 0x1f7   :  { %v2078_v45 = vpop.f32.mrb[6].mxu1 }
 0x1f8   :  { %v951_v3 = vsel %vm949_vm10, %v2078_v45, -inf  ;;  %v870_v16 = vpop.f32.mrb[7].mxu1 }
 0x1f9   :  { %v950_v56 = vsel %vm949_vm10, %v870_v16, -inf }
 0x1fa   :  { %v952_v44 = vmax.f32 %v950_v56, %v951_v3 }
 0x1fb   :  { %v2680_v17 = vpop.f32.mrb[8].mxu1 }
 0x1fc   :  { %v953_v57 = vrot.slane %v952_v44, 4  ;;  %v960_v18 = vsel %vm949_vm10, %v2680_v17, -inf  ;;  %v2684_v19 = vpop.f32.mrb[9].mxu1 }
 0x1fd   :  { %v959_v20 = vsel %vm949_vm10, %v2684_v19, -inf }
 0x1fe   :  { %v954_v21 = vmax.f32 %v952_v44, %v953_v57  ;;  %v961_v22 = vmax.f32 %v959_v20, %v960_v18 }
 0x1ff   :  { %v2688_v23 = vpop.f32.mrb[10].mxu1 }
 0x200   :  { %v955_v24 = vrot.slane %v954_v21, 2  ;;  %v962_v25 = vrot.slane %v961_v22, 4  ;;  %v969_v26 = vsel %vm949_vm10, %v2688_v23, -inf  ;;  %v2692_v27 = vpop.f32.mrb[11].mxu1 }
 0x201   :  { %v968_v53 = vsel %vm949_vm10, %v2692_v27, -inf }
 0x202   :  { %v956_v54 = vmax.f32 %v954_v21, %v955_v24  ;;  %v963_v30 = vmax.f32 %v961_v22, %v962_v25  ;;  %v970_v31 = vmax.f32 %v968_v53, %v969_v26 }
 0x203   :  { %v2696_v32 = vpop.f32.mrb[12].mxu1 }
 0x204   :  { %v957_v28 = vrot.slane %v956_v54, 1  ;;  %v964_v35 = vrot.slane %v963_v30, 2  ;;  %v971_v36 = vrot.slane %v970_v31, 4  ;;  %v978_v55 = vsel %vm949_vm10, %v2696_v32, -inf  ;;  %v2700_v12 = vpop.f32.mrb[13].mxu1 }
 0x205   :  { %v977_v2 = vsel %vm949_vm10, %v2700_v12, -inf }
 0x206   :  { %v958_v5 = vmax.f32 %v956_v54, %v957_v28  ;;  %v965_v13 = vmax.f32 %v963_v30, %v964_v35  ;;  %v972_v9 = vmax.f32 %v970_v31, %v971_v36  ;;  %v979_v34 = vmax.f32 %v977_v2, %v978_v55 }
 0x207   :  { %v2704_v38 = vpop.f32.mrb[14].mxu1 }
 0x208   :  { %v1038_v40 = vmax.f32 %v958_v5, %v2676_v60  ;;  %v966_v46 = vrot.slane %v965_v13, 1  ;;  %v973_v48 = vrot.slane %v972_v9, 2  ;;  %v980_v49 = vrot.slane %v979_v34, 4  ;;  %v2707_v51 = vpop.f32.mrb[15].mxu1 }
 0x209   :  { %v987_v37 = vsel %vm949_vm10, %v2704_v38, -inf  ;;  %v986_v42 = vsel %vm949_vm10, %v2707_v51, -inf }
 0x20a   :  { %v1075_v61 = vrot.slane %v1038_v40, %v2618_v29  ;;  %v967_v62 = vmax.f32 %v965_v13, %v966_v46  ;;  %v974_v63 = vmax.f32 %v972_v9, %v973_v48  ;;  %v981_v41 = vmax.f32 %v979_v34, %v980_v49 }
 0x20b   :  { %v988_v6 = vmax.f32 %v986_v42, %v987_v37  ;;  %v2717_v7 = vpop.f32.mrb[16].mxu1 }
 0x20c   :  { %v1104_v8 = vsub.f32 %v870_v16, %v1075_v61  ;;  %v1105_v11 = vsub.f32 %v2078_v45, %v1075_v61  ;;  %v1039_v47 = vmax.f32 %v967_v62, %v1023_v58  ;;  %v975_v50 = vrot.slane %v974_v63, 1  ;;  %v2719_v52 = vpop.f32.mrb[17].mxu1 }
 0x20d   :  { %v982_v59 = vrot.slane %v981_v41, 2  ;;  %v989_v14 = vrot.slane %v988_v6, 4  ;;  %v996_v10 = vsel %vm949_vm10, %v2717_v7, -inf  ;;  %v995_v15 = vsel %vm949_vm10, %v2719_v52, -inf }
 0x20e   :  { %v1120_v43 = vmul.f32 1.442695, %v1104_v8  ;;  %v1122_v3 = vmul.f32 1.442695, %v1105_v11  ;;  %v1054_v56 = vrot.slane %v1039_v47, 7  ;;  %v1079_v44 = vrot.slane %v1039_v47, %v2618_v29 }
 0x20f   :  { %v976_v57 = vmax.f32 %v974_v63, %v975_v50  ;;  %v983_v16 = vmax.f32 %v981_v41, %v982_v59  ;;  %v990_v45 = vmax.f32 %v988_v6, %v989_v14  ;;  %v997_v18 = vmax.f32 %v995_v15, %v996_v10  ;;  %v2726_v20 = vpop.f32.mrb[18].mxu1 }
 0x210   :  { %2196 = vpow2.f32 %v1120_v43  ;;  %v1055_v21 = vsel %vm204_vm2, %v1054_v56, %v1038_v40  ;;  %v1106_v22 = vsub.f32 %v2684_v19, %v1079_v44  ;;  %v1107_v24 = vsub.f32 %v2680_v17, %v1079_v44  ;;  %v2731_v25 = vpop.f32.mrb[19].mxu1 }
 0x211   :  { %2198 = vpow2.f32 %v1122_v3  ;;  %v1040_v26 = vmax.f32 %v976_v57, %v1024_v39  ;;  %v984_v53 = vrot.slane %v983_v16, 1  ;;  %v991_v54 = vrot.slane %v990_v45, 2 }
 0x212   :  { %v1124_v30 = vmul.f32 1.442695, %v1106_v22  ;;  %v1126_v31 = vmul.f32 1.442695, %v1107_v24  ;;  %v998_v28 = vrot.slane %v997_v18, 4  ;;  %v1005_v35 = vsel %vm949_vm10, %v2726_v20, -inf }
 0x213   :  { %v1056_v36 = vrot.slane %v1040_v26, 6  ;;  %v1083_v55 = vrot.slane %v1040_v26, %v2618_v29  ;;  %v985_v2 = vmax.f32 %v983_v16, %v984_v53  ;;  %v992_v5 = vmax.f32 %v990_v45, %v991_v54  ;;  %v2736_v19 = vpop.f32.mrb[20].mxu1 }
 0x214   :  { %2200 = vpow2.f32 %v1124_v30  ;;  %v999_v17 = vmax.f32 %v997_v18, %v998_v28  ;;  %v1004_v13 = vsel %vm949_vm10, %v2731_v25, -inf  ;;  %v1014_v9 = vsel %vm949_vm10, %v2736_v19, -inf  ;;  %v2742_v34 = vpop.f32.mrb[21].mxu1 }
 0x215   :  { %2202 = vpow2.f32 %v1126_v31  ;;  %v1057_v40 = vsel %vm207_vm3, %v1056_v36, %v1055_v21  ;;  %v1108_v46 = vsub.f32 %v2692_v27, %v1083_v55  ;;  %v1109_v48 = vsub.f32 %v2688_v23, %v1083_v55 }
 0x216   :  { %v1041_v49 = vmax.f32 %v985_v2, %v1025_v4  ;;  %v993_v58 = vrot.slane %v992_v5, 1  ;;  %v1000_v37 = vrot.slane %v999_v17, 2  ;;  %v1006_v42 = vmax.f32 %v1004_v13, %v1005_v35 }
 0x217   :  { %v1128_v61 = vmul.f32 1.442695, %v1108_v46  ;;  %v1130_v62 = vmul.f32 1.442695, %v1109_v48  ;;  %v1026_v63 = vrot.slane %v2676_v60, 4  ;;  %v1013_v41 = vsel %vm949_vm10, %v2742_v34, -inf }
 0x218   :  { %v1058_v39 = vrot.slane %v1041_v49, 5  ;;  %v1087_v6 = vrot.slane %v1041_v49, %v2618_v29  ;;  %v994_v8 = vmax.f32 %v992_v5, %v993_v58  ;;  %v1001_v11 = vmax.f32 %v999_v17, %v1000_v37 }
 0x219   :  { %2204 = vpow2.f32 %v1128_v61  ;;  %v1027_v27 = vrot.slane %v2676_v60, 5  ;;  %v1007_v23 = vrot.slane %v1006_v42, 4  ;;  %v1015_v4 = vmax.f32 %v1013_v41, %v1014_v9 }
 0x21a   :  { %v2752_v47 = vpop.eup %2196  ;;  %2206 = vpow2.f32 %v1130_v62  ;;  %v1059_v50 = vsel %vm210_vm4, %v1058_v39, %v1057_v40  ;;  %v1110_v59 = vsub.f32 %v2700_v12, %v1087_v6  ;;  %v1111_v14 = vsub.f32 %v2696_v32, %v1087_v6 }
 0x21b   :  { %v2757_v10 = vpop.eup %2198  ;;  %v1152_v15 = vsel %vm949_vm10, %v2752_v47, 0.0  ;;  %v1042_v43 = vmax.f32 %v994_v8, %v1026_v63  ;;  %v1002_v3 = vrot.slane %v1001_v11, 1  ;;  %v1008_v56 = vmax.f32 %v1006_v42, %v1007_v23 }
 0x21c   :  { %v1153_v44 = vsel %vm949_vm10, %v2757_v10, 0.0  ;;  %v1132_v57 = vmul.f32 1.442695, %v1110_v59  ;;  %v1134_v16 = vmul.f32 1.442695, %v1111_v14  ;;  %v1016_v45 = vrot.slane %v1015_v4, 4 }
 0x21d   :  { %v1154_v18 = vadd.f32 %v1153_v44, %v1152_v15  ;;  %v1060_v21 = vrot.slane %v1042_v43, 4  ;;  %v1091_v12 = vrot.slane %v1042_v43, %v2618_v29  ;;  %v1003_v22 = vmax.f32 %v1001_v11, %v1002_v3 }
 0x21e   :  { %v2764_v32 = vpop.eup %2200  ;;  %2208 = vpow2.f32 %v1132_v57  ;;  %v1009_v24 = vrot.slane %v1008_v56, 2  ;;  %v1028_v26 = vrot.slane %v2676_v60, 6  ;;  %v1017_v53 = vmax.f32 %v1015_v4, %v1016_v45 }
 0x21f   :  { %v2767_v54 = vpop.eup %2202  ;;  %v1155_v30 = vrot.slane %v1154_v18, 4  ;;  %v1161_v31 = vsel %vm949_vm10, %v2764_v32, 0.0  ;;  %2210 = vpow2.f32 %v1134_v16  ;;  %v1061_v28 = vsel %vm213_vm5, %v1060_v21, %v1059_v50 }
 0x220   :  { %v1162_v35 = vsel %vm949_vm10, %v2767_v54, 0.0  ;;  %v1112_v36 = vsub.f32 %v2707_v51, %v1091_v12  ;;  %v1113_v55 = vsub.f32 %v2704_v38, %v1091_v12  ;;  %v1043_v2 = vmax.f32 %v1003_v22, %v1027_v27 }
 0x221   :  { %v1156_v5 = vadd.f32 %v1155_v30, %v1154_v18  ;;  %v1163_v17 = vadd.f32 %v1162_v35, %v1161_v31  ;;  %v1010_v13 = vmax.f32 %v1008_v56, %v1009_v24  ;;  %v1018_v9 = vrot.slane %v1017_v53, 2 }
 0x222   :  { %v1136_v40 = vmul.f32 1.442695, %v1112_v36  ;;  %v1138_v46 = vmul.f32 1.442695, %v1113_v55  ;;  %v1062_v48 = vrot.slane %v1043_v2, 3  ;;  %v1095_v49 = vrot.slane %v1043_v2, %v2618_v29 }
 0x223   :  { %v2777_v58 = vpop.eup %2204  ;;  %v1157_v37 = vrot.slane %v1156_v5, 2  ;;  %v1164_v42 = vrot.slane %v1163_v17, 4  ;;  %v1011_v61 = vrot.slane %v1010_v13, 1  ;;  %v1019_v62 = vmax.f32 %v1017_v53, %v1018_v9 }
 0x224   :  { %v2779_v63 = vpop.eup %2206  ;;  %v1170_v38 = vsel %vm949_vm10, %v2777_v58, 0.0  ;;  %2212 = vpow2.f32 %v1136_v40  ;;  %v1063_v51 = vsel %vm216_vm6, %v1062_v48, %v1061_v28  ;;  %v1114_v41 = vsub.f32 %v2719_v52, %v1095_v49 }
 0x225   :  { %v1158_v39 = vadd.f32 %v1157_v37, %v1156_v5  ;;  %v1165_v6 = vadd.f32 %v1164_v42, %v1163_v17  ;;  %v1171_v8 = vsel %vm949_vm10, %v2779_v63, 0.0  ;;  %2214 = vpow2.f32 %v1138_v46 }
 0x226   :  { %v1172_v11 = vadd.f32 %v1171_v8, %v1170_v38  ;;  %v1115_v27 = vsub.f32 %v2717_v7, %v1095_v49  ;;  %v1140_v23 = vmul.f32 1.442695, %v1114_v41  ;;  %v1012_v4 = vmax.f32 %v1010_v13, %v1011_v61 }
 0x227   :  { %v1159_v50 = vrot.slane %v1158_v39, 1  ;;  %v1166_v59 = vrot.slane %v1165_v6, 2  ;;  %v1020_v14 = vrot.slane %v1019_v62, 1  ;;  %v1029_v7 = vrot.slane %v2676_v60, 7 }
 0x228   :  { %v2788_v15 = vpop.eup %2208  ;;  %v1173_v43 = vrot.slane %v1172_v11, 4  ;;  %2216 = vpow2.f32 %v1140_v23  ;;  %v1142_v3 = vmul.f32 1.442695, %v1115_v27  ;;  %v1044_v52 = vmax.f32 %v1012_v4, %v1028_v26 }
 0x229   :  { %v2790_v56 = vpop.eup %2210  ;;  %v1167_v44 = vadd.f32 %v1166_v59, %v1165_v6  ;;  %v1179_v57 = vsel %vm949_vm10, %v2788_v15, 0.0  ;;  %v1021_v16 = vmax.f32 %v1019_v62, %v1020_v14  ;;  %v1160_v53 = vadd.f32 %v1159_v50, %v1158_v39 }
 0x22a   :  { %v1174_v45 = vadd.f32 %v1173_v43, %v1172_v11  ;;  %v1180_v18 = vsel %vm949_vm10, %v2790_v56, 0.0  ;;  %2218 = vpow2.f32 %v1142_v3  ;;  %v1064_v21 = vrot.slane %v1044_v52, 2 }
 0x22b   :  { %v1168_v12 = vrot.slane %v1167_v44, 1  ;;  %v1181_v22 = vadd.f32 %v1180_v18, %v1179_v57  ;;  %v1099_v24 = vrot.slane %v1044_v52, %v2618_v29  ;;  %v1045_v26 = vmax.f32 %v1021_v16, %v1029_v7 }
 0x22c   :  { %v1175_v30 = vrot.slane %v1174_v45, 2  ;;  %v1065_v31 = vsel %vm219_vm7, %v1064_v21, %v1063_v51 }
 0x22d   :  { %v1169_v28 = vadd.f32 %v1168_v12, %v1167_v44  ;;  %v1182_v35 = vrot.slane %v1181_v22, 4  ;;  %v1116_v36 = vsub.f32 %v2731_v25, %v1099_v24  ;;  %v1117_v55 = vsub.f32 %v2726_v20, %v1099_v24 }
 0x22e   :  { %v2801_v2 = vpop.eup %2212  ;;  %v1176_v5 = vadd.f32 %v1175_v30, %v1174_v45  ;;  %v1066_v17 = vrot.slane %v1045_v26, 1  ;;  %v1103_v13 = vrot.slane %v1045_v26, %v2618_v29 }
 0x22f   :  { %v2804_v9 = vpop.eup %2214  ;;  %v1232_v40 = vsel %vm204_vm2, %v1169_v28, %v1160_v53  ;;  %v1183_v46 = vadd.f32 %v1182_v35, %v1181_v22  ;;  %v1188_v48 = vsel %vm949_vm10, %v2801_v2, 0.0  ;;  %v1144_v49 = vmul.f32 1.442695, %v1116_v36 }
 0x230   :  { %v1177_v37 = vrot.slane %v1176_v5, 1  ;;  %v1189_v25 = vsel %vm949_vm10, %v2804_v9, 0.0  ;;  %v1146_v20 = vmul.f32 1.442695, %v1117_v55  ;;  %v1067_v42 = vsel %vm222_vm8, %v1066_v17, %v1065_v31 }
 0x231   :  { %v1184_v61 = vrot.slane %v1183_v46, 2  ;;  %v1190_v62 = vadd.f32 %v1189_v25, %v1188_v48  ;;  %2220 = vpow2.f32 %v1144_v49  ;;  %v1069_v29 = vsub.f32 %v2676_v60, %v1067_v42 }
 0x232   :  { %v2813_v38 = vpop.eup %2216  ;;  %v1178_v51 = vadd.f32 %v1177_v37, %v1176_v5  ;;  %2222 = vpow2.f32 %v1146_v20  ;;  %v1118_v41 = vsub.f32 %v2742_v34, %v1103_v13  ;;  %v1119_v39 = vsub.f32 %v2736_v19, %v1103_v13 }
 0x233   :  { %v1185_v6 = vadd.f32 %v1184_v61, %v1183_v46  ;;  %v1191_v8 = vrot.slane %v1190_v62, 4  ;;  %v1197_v11 = vsel %vm949_vm10, %v2813_v38, 0.0  ;;  %v1070_v27 = vmul.f32 1.442695, %v1069_v29  ;;  %v1763_v29 = vld [vmem:[%s2929_s7 + $0x18] sm:$0xff] }
 0x234   :  { %v2819_v23 = vpop.eup %2218  ;;  %v1233_v4 = vsel %vm207_vm3, %v1178_v51, %v1232_v40  ;;  %v1148_v50 = vmul.f32 1.442695, %v1118_v41  ;;  %v1150_v60 = vmul.f32 1.442695, %v1119_v39  ;;  %v1613_v51 = vpop.permute.xlu1 %1612 }
 0x235   :  { %v1186_v59 = vrot.slane %v1185_v6, 1  ;;  %v1192_v14 = vadd.f32 %v1191_v8, %v1190_v62  ;;  %v1198_v43 = vsel %vm949_vm10, %v2819_v23, 0.0  ;;  %2224 = vpow2.f32 %v1070_v27 }
 0x236   :  { %v1199_v34 = vadd.f32 %v1198_v43, %v1197_v11  ;;  %2226 = vpow2.f32 %v1148_v50 }
 0x237   :  { %v1187_v19 = vadd.f32 %v1186_v59, %v1185_v6  ;;  %v1193_v3 = vrot.slane %v1192_v14, 2  ;;  %2228 = vpow2.f32 %v1150_v60 }
 0x238   :  { %v1200_v52 = vrot.slane %v1199_v34, 4  ;;  %v1611_v39 = vpop.permute.xlu1 %1610 }
 0x239   :  { %v1234_v44 = vsel %vm210_vm4, %v1187_v19, %v1233_v4  ;;  %v1194_v57 = vadd.f32 %v1193_v3, %v1192_v14 }
 0x23a   :  { %v1201_v16 = vadd.f32 %v1200_v52, %v1199_v34 }
 0x23b   :  { %v2221_v7 = vpop.eup %2220  ;;  %v1195_v45 = vrot.slane %v1194_v57, 1 }
 0x23c   :  { %v2223_v18 = vpop.eup %2222  ;;  %v1202_v21 = vrot.slane %v1201_v16, 2  ;;  %v1206_v12 = vsel %vm949_vm10, %v2221_v7, 0.0  ;;  %v1617_v27 = vpop.permute.xlu1 %1616 }
 0x23d   :  { %v1196_v22 = vadd.f32 %v1195_v45, %v1194_v57  ;;  %v1207_v24 = vsel %vm949_vm10, %v2223_v18, 0.0 }
 0x23e   :  { %v1203_v26 = vadd.f32 %v1202_v21, %v1201_v16  ;;  %v1208_v53 = vadd.f32 %v1207_v24, %v1206_v12 }
 0x23f   :  { %v2225_v30 = vpop.eup %2224  ;;  %v1235_v31 = vsel %vm213_vm5, %v1196_v22, %v1234_v44 }
 0x240   :  { %v2227_v28 = vpop.eup %2226  ;;  %v1204_v35 = vrot.slane %v1203_v26, 1  ;;  %v1209_v36 = vrot.slane %v1208_v53, 4  ;;  %2103 = vmatmul.mubr.msk.f32.vlgmr.msra.gmra.mrb[16].mxu0 %vm949_vm10, %v2225_v30  ;;  %v1621_v34 = vpop.permute.xlu1 %1620 }
 0x241   :  { %v2229_v55 = vpop.eup %2228  ;;  %v1215_v5 = vsel %vm949_vm10, %v2227_v28, 0.0  ;;  %2106 = vmatpush3.msk.msra.mxu0 %vm1245_vm9, %v2667_v33  ;;  %2107 = vmatprep.mubr.msk.f32.mxu0 %vm949_vm10, %v2752_v47 }
 0x242   :  { %v1205_v17 = vadd.f32 %v1204_v35, %v1203_v26  ;;  %v1210_v13 = vadd.f32 %v1209_v36, %v1208_v53  ;;  %v1216_v40 = vsel %vm949_vm10, %v2229_v55, 0.0 }
 0x243   :  { %v1217_v46 = vadd.f32 %v1216_v40, %v1215_v5 }
 0x244   :  { %v1236_v48 = vsel %vm216_vm6, %v1205_v17, %v1235_v31  ;;  %v1211_v49 = vrot.slane %v1210_v13, 2  ;;  %2108 = vmatmul.mubr.msk.f32.vlgmr.msra.gmra.mrb[18].mxu0 %vm949_vm10, %v2757_v10  ;;  %v1625_v53 = vpop.permute.xlu1 %1624 }
 0x245   :  { %v1218_v37 = vrot.slane %v1217_v46, 4  ;;  %2110 = vmatprep.mubr.msk.f32.mxu0 %vm949_vm10, %v2764_v32 }
 0x246   :  { %v1212_v25 = vadd.f32 %v1211_v49, %v1210_v13 }
 0x247   :  { %v1219_v33 = vadd.f32 %v1218_v37, %v1217_v46 }
 0x248   :  { %v1213_v20 = vrot.slane %v1212_v25, 1  ;;  %2111 = vmatmul.mubr.msk.f32.gmra.mrb[20].mxu0 %vm949_vm10, %v2767_v54 }
 0x249   :  { %v1220_v47 = vrot.slane %v1219_v33, 2  ;;  %2113 = vmatprep.mubr.msk.f32.mxu0 %vm949_vm10, %v2777_v58 }
 0x24a   :  { %v1214_v42 = vadd.f32 %v1213_v20, %v1212_v25 }
 0x24b   :  { %v1221_v61 = vadd.f32 %v1220_v47, %v1219_v33 }
 0x24c   :  { %v1237_v62 = vsel %vm219_vm7, %v1214_v42, %v1236_v48  ;;  %2114 = vmatmul.mubr.msk.f32.gmra.mrb[22].mxu0 %vm949_vm10, %v2779_v63  ;;  %v1629_v42 = vpop.permute.xlu1 %1628 }
 0x24d   :  { %v1222_v10 = vrot.slane %v1221_v61, 1  ;;  %2116 = vmatprep.mubr.msk.f32.mxu0 %vm949_vm10, %v2788_v15  ;;  %v1760_v15 = vld [vmem:[%s2929_s7] sm:$0xff] }
 0x24f   :  { %v1223_v32 = vadd.f32 %v1222_v10, %v1221_v61 }
 0x250   :  { %2117 = vmatmul.mubr.msk.f32.gmra.mrb[24].mxu0 %vm949_vm10, %v2790_v56  ;;  %v1761_v56 = vld [vmem:[%s2929_s7 + $0x8] sm:$0xff] }
 0x251   :  { %v1238_v54 = vsel %vm222_vm8, %v1223_v32, %v1237_v62  ;;  %2119 = vmatprep.mubr.msk.f32.mxu0 %vm949_vm10, %v2801_v2  ;;  %v2182_v2 = vpack.c.bf16 %v1761_v56, %v1760_v15 }
 0x252   :  { %v1240_v58 = vadd.f32 %v2225_v30, %v1238_v54 }
 0x254   :  { %2230 = vrcp.f32 %v1240_v58  ;;  %2120 = vmatmul.mubr.msk.f32.gmra.mrb[26].mxu0 %vm949_vm10, %v2804_v9  ;;  %v1762_v9 = vld [vmem:[%s2929_s7 + $0x10] sm:$0xff] }
 0x255   :  { %2122 = vmatprep.mubr.msk.f32.mxu0 %vm949_vm10, %v2813_v38  ;;  %v2185_v38 = vpack.c.bf16 %v1763_v29, %v1762_v9 }
 0x258   :  { %2123 = vmatmul.mubr.msk.f32.gmra.mrb[28].mxu0 %vm949_vm10, %v2819_v23 }
 0x259   :  { %2125 = vmatprep.mubr.msk.f32.mxu0 %vm949_vm10, %v2221_v7 }
 0x25c   :  { %2126 = vmatmul.mubr.msk.f32.gmra.mrb[30].mxu0 %vm949_vm10, %v2223_v18 }
 0x25d   :  { %2128 = vmatprep.mubr.msk.f32.mxu0 %vm949_vm10, %v2227_v28 }
 0x25e   :  { %v2231_v63 = vpop.eup %2230 }
 0x25f   :  { %2134 = vmatmul.mubr.msk.f32.vlgmr.msra.gmra.mrb[22].mxu1 %vm949_vm10, %v2231_v63 }
 0x260   :  { %2129 = vmatmul.mubr.msk.f32.gmra.mrb[32].mxu0 %vm949_vm10, %v2229_v55  ;;  %2144 = vmatprep.mubr.msk.f32.mxu1 %vm2284_vm0, %v2285_v1  ;;  %v1609_v1 = vpop.permute.xlu0 %1608 }
 0x261   :  { %2183 = vmatpush3.bf16.msra.mxu1 %v2182_v2 }
 0x262   :  { %2184 = vmatprep.subr.bf16.mxu1 %v2283_v0 }
 0x264   :  { %v1607_v41 = vpop.permute.xlu0 %1606 }
 0x265   :  { %2186 = vmatpush3.bf16.msra.mxu1 %v2185_v38 }
 0x268   :  { %v1615_v8 = vpop.permute.xlu0 %1614 }
 0x26c   :  { %v1619_v59 = vpop.permute.xlu0 %1618 }
 0x270   :  { %v1623_v18 = vpop.permute.xlu0 %1622 }
 0x274   :  { %v1627_v48 = vpop.permute.xlu0 %1626 }
 0x313   :  { %v2880_v6 = vpop.f32.mrb[16].mxu0 }
 0x314   :  { %v2104_v11 = vpop.f32.mrb[17].mxu0 }
 0x317   :  { %v2109_v23 = vpop.f32.mrb[18].mxu0 }
 0x318   :  { %v1655_v4 = vmul.f32 %v2109_v23, %v1609_v1  ;;  %v1433_v50 = vpop.f32.mrb[19].mxu0  ;;  %v1631_v1 = vpop.permute.xlu0 %1630 }
 0x319   :  { %v1654_v60 = vmul.f32 %v1607_v41, %v1433_v50 }
 0x31a   :  { %v1671_v14 = vsel %vm69_vm1, %v1655_v4, 0.0  ;;  %v1633_v4 = vpop.permute.xlu1 %1632 }
 0x31b   :  { %v1670_v43 = vsel %vm69_vm1, %v1654_v60, 0.0  ;;  %v2112_v0 = vpop.f32.mrb[20].mxu0 }
 0x31c   :  { %v1672_v19 = vadd.f32 %v1671_v14, %v1670_v43  ;;  %v1657_v3 = vmul.f32 %v2112_v0, %v1613_v51  ;;  %v1443_v52 = vpop.f32.mrb[21].mxu0 }
 0x31d   :  { %v1656_v44 = vmul.f32 %v1611_v39, %v1443_v52 }
 0x31e   :  { %v1673_v57 = vrot.slane %v1672_v19, 4  ;;  %v1680_v16 = vsel %vm69_vm1, %v1657_v3, 0.0 }
 0x31f   :  { %v1679_v7 = vsel %vm69_vm1, %v1656_v44, 0.0  ;;  %v2115_v45 = vpop.f32.mrb[22].mxu0 }
 0x320   :  { %v1674_v21 = vadd.f32 %v1673_v57, %v1672_v19  ;;  %v1681_v12 = vadd.f32 %v1680_v16, %v1679_v7  ;;  %v1659_v22 = vmul.f32 %v2115_v45, %v1617_v27  ;;  %v1453_v24 = vpop.f32.mrb[23].mxu0  ;;  %v1635_v45 = vpop.permute.xlu0 %1634 }
 0x321   :  { %v1658_v26 = vmul.f32 %v1615_v8, %v1453_v24 }
 0x322   :  { %v1675_v30 = vrot.slane %v1674_v21, 2  ;;  %v1682_v31 = vrot.slane %v1681_v12, 4  ;;  %v1689_v28 = vsel %vm69_vm1, %v1659_v22, 0.0 }
 0x323   :  { %v1688_v35 = vsel %vm69_vm1, %v1658_v26, 0.0  ;;  %v2118_v36 = vpop.f32.mrb[24].mxu0 }
 0x324   :  { %v1676_v55 = vadd.f32 %v1675_v30, %v1674_v21  ;;  %v1683_v5 = vadd.f32 %v1682_v31, %v1681_v12  ;;  %v1690_v17 = vadd.f32 %v1689_v28, %v1688_v35  ;;  %v1661_v13 = vmul.f32 %v2118_v36, %v1621_v34  ;;  %v1463_v40 = vpop.f32.mrb[25].mxu0  ;;  %v1637_v28 = vpop.permute.xlu1 %1636 }
 0x325   :  { %v1660_v46 = vmul.f32 %v1619_v59, %v1463_v40 }
 0x326   :  { %v1684_v49 = vrot.slane %v1683_v5, 2  ;;  %v1691_v37 = vrot.slane %v1690_v17, 4  ;;  %v1698_v25 = vsel %vm69_vm1, %v1661_v13, 0.0  ;;  %v1677_v33 = vrot.slane %v1676_v55, 1 }
 0x327   :  { %v1697_v20 = vsel %vm69_vm1, %v1660_v46, 0.0  ;;  %v2121_v47 = vpop.f32.mrb[26].mxu0 }
 0x328   :  { %v1685_v61 = vadd.f32 %v1684_v49, %v1683_v5  ;;  %v1692_v62 = vadd.f32 %v1691_v37, %v1690_v17  ;;  %v1699_v10 = vadd.f32 %v1698_v25, %v1697_v20  ;;  %v1473_v32 = vpop.f32.mrb[27].mxu0  ;;  %v1663_v54 = vmul.f32 %v2121_v47, %v1625_v53 }
 0x329   :  { %v1662_v58 = vmul.f32 %v1623_v18, %v1473_v32  ;;  %v1678_v2 = vadd.f32 %v1677_v33, %v1676_v55 }
 0x32a   :  { %v1686_v63 = vrot.slane %v1685_v61, 1  ;;  %v1693_v15 = vrot.slane %v1692_v62, 2  ;;  %v1700_v56 = vrot.slane %v1699_v10, 4  ;;  %v1707_v9 = vsel %vm69_vm1, %v1663_v54, 0.0 }
 0x32b   :  { %v1706_v29 = vsel %vm69_vm1, %v1662_v58, 0.0  ;;  %v2124_v38 = vpop.f32.mrb[28].mxu0 }
 0x32c   :  { %v1687_v51 = vadd.f32 %v1686_v63, %v1685_v61  ;;  %v1694_v41 = vadd.f32 %v1693_v15, %v1692_v62  ;;  %v1701_v39 = vadd.f32 %v1700_v56, %v1699_v10  ;;  %v1708_v8 = vadd.f32 %v1707_v9, %v1706_v29  ;;  %v1483_v11 = vpop.f32.mrb[29].mxu0 }
 0x32d   :  { %v1665_v27 = vmul.f32 %v2124_v38, %v1629_v42  ;;  %v1664_v23 = vmul.f32 %v1627_v48, %v1483_v11 }
 0x32e   :  { %v1750_v50 = vsel %vm204_vm2, %v1687_v51, %v1678_v2  ;;  %v1695_v60 = vrot.slane %v1694_v41, 1  ;;  %v1702_v59 = vrot.slane %v1701_v39, 2  ;;  %v1709_v14 = vrot.slane %v1708_v8, 4 }
 0x32f   :  { %v1716_v43 = vsel %vm69_vm1, %v1665_v27, 0.0  ;;  %v1715_v0 = vsel %vm69_vm1, %v1664_v23, 0.0  ;;  %v2127_v34 = vpop.f32.mrb[30].mxu0 }
 0x330   :  { %v1696_v19 = vadd.f32 %v1695_v60, %v1694_v41  ;;  %v1703_v3 = vadd.f32 %v1702_v59, %v1701_v39  ;;  %v1710_v52 = vadd.f32 %v1709_v14, %v1708_v8  ;;  %v1717_v44 = vadd.f32 %v1716_v43, %v1715_v0  ;;  %v1493_v57 = vpop.f32.mrb[31].mxu0  ;;  %v1587_v41 = vpop.permute.xlu0 %1586 }
 0x331   :  { %v1667_v16 = vmul.f32 %v2127_v34, %v1633_v4  ;;  %v1666_v7 = vmul.f32 %v1631_v1, %v1493_v57  ;;  %v1589_v8 = vmul.f32 %v1587_v41, %v2880_v6  ;;  %v1920_v4 = vld [vmem:[%s2930_s8] ss:$0 sm:$0xff] }
 0x332   :  { %v1751_v18 = vsel %vm207_vm3, %v1696_v19, %v1750_v50  ;;  %v1704_v21 = vrot.slane %v1703_v3, 1  ;;  %v1711_v12 = vrot.slane %v1710_v52, 2  ;;  %v1718_v22 = vrot.slane %v1717_v44, 4  ;;  %v1581_v24 = vpop.f32.mrb[22].mxu1 }
 0x333   :  { %v1725_v26 = vsel %vm69_vm1, %v1667_v16, 0.0  ;;  %v1724_v53 = vsel %vm69_vm1, %v1666_v7, 0.0  ;;  %v2135_v30 = vpop.f32.mrb[23].mxu1  ;;  %v2130_v31 = vpop.f32.mrb[32].mxu0 }
 0x334   :  { %v1705_v35 = vadd.f32 %v1704_v21, %v1703_v3  ;;  %v1712_v36 = vadd.f32 %v1711_v12, %v1710_v52  ;;  %v1719_v55 = vadd.f32 %v1718_v22, %v1717_v44  ;;  %v1726_v5 = vadd.f32 %v1725_v26, %v1724_v53  ;;  %v1503_v17 = vpop.f32.mrb[33].mxu0 }
 0x335   :  { %v1669_v13 = vmul.f32 %v2130_v31, %v1637_v28  ;;  %v1668_v40 = vmul.f32 %v1635_v45, %v1503_v17 }
 0x336   :  { %v1752_v46 = vsel %vm210_vm4, %v1705_v35, %v1751_v18  ;;  %v1713_v48 = vrot.slane %v1712_v36, 1  ;;  %v1720_v49 = vrot.slane %v1719_v55, 2  ;;  %v1727_v37 = vrot.slane %v1726_v5, 4 }
 0x337   :  { %v1734_v25 = vsel %vm69_vm1, %v1669_v13, 0.0  ;;  %v1733_v33 = vsel %vm69_vm1, %v1668_v40, 0.0 }
 0x338   :  { %v1714_v20 = vadd.f32 %v1713_v48, %v1712_v36  ;;  %v1721_v47 = vadd.f32 %v1720_v49, %v1719_v55  ;;  %v1728_v42 = vadd.f32 %v1727_v37, %v1726_v5  ;;  %v1735_v61 = vadd.f32 %v1734_v25, %v1733_v33 }
 0x33a   :  { %v1753_v62 = vsel %vm213_vm5, %v1714_v20, %v1752_v46  ;;  %v1722_v10 = vrot.slane %v1721_v47, 1  ;;  %v1729_v32 = vrot.slane %v1728_v42, 2  ;;  %v1736_v54 = vrot.slane %v1735_v61, 4 }
 0x33c   :  { %v1723_v58 = vadd.f32 %v1722_v10, %v1721_v47  ;;  %v1730_v63 = vadd.f32 %v1729_v32, %v1728_v42  ;;  %v1737_v15 = vadd.f32 %v1736_v54, %v1735_v61 }
 0x33e   :  { %v1754_v56 = vsel %vm216_vm6, %v1723_v58, %v1753_v62  ;;  %v1731_v2 = vrot.slane %v1730_v63, 1  ;;  %v1738_v9 = vrot.slane %v1737_v15, 2 }
 0x340   :  { %v1732_v29 = vadd.f32 %v1731_v2, %v1730_v63  ;;  %v1739_v38 = vadd.f32 %v1738_v9, %v1737_v15 }
 0x342   :  { %v1755_v1 = vsel %vm219_vm7, %v1732_v29, %v1754_v56  ;;  %v1740_v51 = vrot.slane %v1739_v38, 1 }
 0x344   :  { %v1741_v39 = vadd.f32 %v1740_v51, %v1739_v38 }
 0x346   :  { %v1756_v11 = vsel %vm222_vm8, %v1741_v39, %v1755_v1 }
 0x347   :  { %v1758_v27 = vadd.f32 %v1756_v11, %v1589_v8 }
 0x349   :  { %v1759_v23 = vmul.f32 %v1758_v27, %v1581_v24 }
 0x34b   :  { %2145 = vmatmul.mubr.msk.f32.vlgmr.msra.gmra.mrb[24].mxu1 %vm69_vm1, %v1759_v23 }
 0x41e   :  { %v1840_v50 = vpop.f32.mrb[24].mxu1 }
 0x41f   :  { %v1841_v60 = vadd.f32 %v1920_v4, %v1840_v50  ;;  %v2146_v59 = vpop.f32.mrb[25].mxu1 }
 0x421   :  { %1845 = vst.msk [vmem:[#allocation5] sm:$0xff] %vm1844_vm11, %v1841_v60 }
 0x422   :  { %2265 = shalt.err (!%p2262_p12)
}
 0x423   :  { %s2266_s30 = scalar_lea.hbm %s2933_s11, 128 }
 0x424   :  { %p2267_p13 = scmp.ne.s32.totalorder %s2933_s11, %s2266_s30  ;;  %p2270_p0 = scmp.lt.u32.totalorder %s2266_s30, %s2933_s11 }
 0x426   :  { %p2272_p1 = pnand %p2270_p0, %p2267_p13 }
 0x428   :  { %2275 = shalt.err (!%p2272_p1)
}
 0x429   :  { %1855 = dma.vmem_to_hbm [thread:$0]  %s1853_s28, 128, %s2933_s11, [#allocation4]  }
 0x42a   :  { %2278 = dma.done.wait [#allocation4], 128  }
 0x42b   :  { %2279 = vsyncadd [#allocation4], 4294967168 }
 0x42c   :  { %1859 = vsyncpa [#allocation3], 1 }
 0x42d   :  { %1860 = vsyncpa [#allocation4], 1 }

</bundles_post_ra>
